<compile_context>
chip_gen: v7x
topology: tpu7x:2x2x1
jax: 0.10.0
libtpu: 0.0.40
codegen_flags: <defaults>
</compile_context>

<pallas_src>
import math

import jax
import jax.numpy as jnp
from jax.experimental import pallas as pl
from jax.experimental.pallas import tpu as pltpu

# ----------------------------- model dims (small) -----------------------------
B = 2        # batch (number of "texts")
S = 8        # sequence length
D = 32       # hidden size
H = 4        # attention heads
DH = D // H
F = 64       # FFN hidden size
L = 2        # transformer layers
V = 100      # vocab size
VP = 128     # vocab padded to a full 128-lane tile for the one-hot gather
EPS = 1e-5
BS = B * S


# ----------------------------- in-kernel helpers ------------------------------
def _layernorm(x, g, b):
    mu = jnp.mean(x, axis=-1, keepdims=True)
    var = jnp.mean((x - mu) ** 2, axis=-1, keepdims=True)
    return (x - mu) * jax.lax.rsqrt(var + EPS) * g + b


def _gelu(x):
    c = math.sqrt(2.0 / math.pi)
    return 0.5 * x * (1.0 + jnp.tanh(c * (x + 0.044715 * x * x * x)))


# ----------------------------- fused Pallas kernel -----------------------------
def encoder_kernel(ids_ref, bias_ref, pool_ref, tok_ref, pos_ref, eg_ref, eb_ref,
                   wqkv_ref, bq_ref, wo_ref, bo_ref, g1_ref, be1_ref,
                   w1_ref, bb1_ref, w2_ref, bb2_ref, g2_ref, be2_ref,
                   o_ref):
    # ---- embedding gather as a lane-aligned one-hot matmul (VP = 128 lanes)
    ids = ids_ref[...]                                           # (BS, 1) int32
    iota = jax.lax.broadcasted_iota(jnp.int32, (BS, VP), 1)
    onehot = jnp.where(ids == iota, 1.0, 0.0).astype(jnp.bfloat16)
    x = jnp.dot(onehot, tok_ref[...], preferred_element_type=jnp.float32)   # (BS, D)
    x = x + pos_ref[...]                                         # pos_emb pre-tiled (BS, D)
    x = _layernorm(x, eg_ref[...], eb_ref[...])

    attn_bias = bias_ref[...]                                    # (BS, BS) block-diag mask

    # ---- transformer layers (stacked-L weights; static unrolled loop)
    for l in range(L):
        # fused full-width QKV projection: one MXU op per layer
        qkv = jnp.dot(x.astype(jnp.bfloat16), wqkv_ref[l],
                      preferred_element_type=jnp.float32)        # (BS, 3D) f32
        q = qkv[:, :D] + bq_ref[l]      # 1/sqrt(DH) folded into wq/bq; bk dropped
        k = qkv[:, D:2 * D]
        v = qkv[:, 2 * D:]              # bv folded into bo at pack time

        ctx_heads = []
        for h in range(H):
            sl = slice(h * DH, (h + 1) * DH)                     # cheap DH=8 lane slice
            s = jnp.dot(q[:, sl], k[:, sl].T,
                        preferred_element_type=jnp.float32) + attn_bias   # (BS, BS)
            s = s - jnp.max(s, axis=-1, keepdims=True)
            p = jnp.exp(s)
            p = p * pl.reciprocal(jnp.sum(p, axis=-1, keepdims=True), approx=True)
            ctx_heads.append(jnp.dot(p, v[:, sl], preferred_element_type=jnp.float32))
        ctx = jnp.concatenate(ctx_heads, axis=-1)                # (BS, D) single lane concat

        attn = jnp.dot(ctx.astype(jnp.bfloat16), wo_ref[l],
                       preferred_element_type=jnp.float32) + bo_ref[l]
        h1 = _layernorm(x + attn, g1_ref[l], be1_ref[l])

        ff = _gelu(jnp.dot(h1.astype(jnp.bfloat16), w1_ref[l],
                           preferred_element_type=jnp.float32) + bb1_ref[l])
        ff = jnp.dot(ff.astype(jnp.bfloat16), w2_ref[l],
                     preferred_element_type=jnp.float32) + bb2_ref[l]
        x = _layernorm(h1 + ff, g2_ref[l], be2_ref[l])

    # ---- masked mean pooling: one exact matmul (mask/len folded into pool matrix)
    o_ref[...] = jnp.dot(pool_ref[...], x, preferred_element_type=jnp.float32)


# ----------------------------- pallas_call wrapper ------------------------------
def language_encoder_forward(ids, mask, packed):
    """ids: (B, S) int32, mask: (B, S) float32 -> (B, D) sentence embeddings."""
    ids2 = ids.reshape(BS, 1).astype(jnp.int32)
    maskf = mask.astype(jnp.float32)

    # block-diagonal additive attention mask over the flattened (BS, BS) scores:
    # 0 where query & key are in the same sequence and the key is valid, else -1e9.
    same_seq = (jnp.arange(BS)[:, None] // S) == (jnp.arange(BS)[None, :] // S)
    key_valid = maskf.reshape(1, BS) > 0.5
    attn_bias = jnp.where(same_seq & key_valid, 0.0, -1e9).astype(jnp.float32)

    # pooling matrix: row b holds mask_b / len_b in block b (exact divide, done here).
    lens = jnp.maximum(jnp.sum(maskf, axis=1, keepdims=True), 1.0)
    pool_mat = jnp.einsum("bc,bs->bcs", jnp.eye(B, dtype=jnp.float32),
                          maskf / lens).reshape(B, BS)

    ins = [ids2, attn_bias, pool_mat,
           packed["tok_emb"], packed["pos_emb"], packed["emb_g"], packed["emb_b"],
           packed["wqkv"], packed["bq"], packed["wo"], packed["bo"],
           packed["g1"], packed["be1"], packed["w1"], packed["bb1"],
           packed["w2"], packed["bb2"], packed["g2"], packed["be2"]]
    return pl.pallas_call(
        encoder_kernel,
        out_shape=jax.ShapeDtypeStruct((B, D), jnp.float32),
        in_specs=[pl.BlockSpec(memory_space=pltpu.MemorySpace.VMEM) for _ in ins],
        out_specs=pl.BlockSpec(memory_space=pltpu.MemorySpace.VMEM),
    )(*ins)


# ----------------------------- parameters -------------------------------------
def init_params(key):
    ks = jax.random.split(key, 4 + 4 * L)
    sc = 0.02
    params = {
        "tok_emb": sc * jax.random.normal(ks[0], (V, D), jnp.float32),
        "pos_emb": sc * jax.random.normal(ks[1], (S, D), jnp.float32),
        "emb_g": jnp.ones((1, D), jnp.float32),
        "emb_b": jnp.zeros((1, D), jnp.float32),
        "layers": [],
    }
    for l in range(L):
        k0, k1, k2, k3 = ks[4 + 4 * l:8 + 4 * l]
        params["layers"].append({
            "wqkv": sc * jax.random.normal(k0, (D, 3 * D), jnp.float32),
            "bqkv": jnp.zeros((1, 3 * D), jnp.float32),
            "wo": sc * jax.random.normal(k1, (D, D), jnp.float32),
            "bo": jnp.zeros((1, D), jnp.float32),
            "g1": jnp.ones((1, D), jnp.float32),
            "be1": jnp.zeros((1, D), jnp.float32),
            "w1": sc * jax.random.normal(k2, (D, F), jnp.float32),
            "bb1": jnp.zeros((1, F), jnp.float32),
            "w2": sc * jax.random.normal(k3, (F, D), jnp.float32),
            "bb2": jnp.zeros((1, D), jnp.float32),
            "g2": jnp.ones((1, D), jnp.float32),
            "be2": jnp.zeros((1, D), jnp.float32),
        })
    return params


def pack_params(params):
    """Repack dense per-layer params for the kernel:
      - 1/sqrt(DH) folded into wq / bq,
      - bk dropped (softmax-invariant), bv folded through wo into bo (exact),
      - pos_emb pre-tiled to (BS, D), vocab padded to 128 rows,
      - big matmul weights stored in bfloat16 (MXU-native)."""
    scale = 1.0 / math.sqrt(DH)
    layers = params["layers"]
    wqkv, bq, wo, bo = [], [], [], []
    for p in layers:
        wq = p["wqkv"][:, :D] * scale
        wk = p["wqkv"][:, D:2 * D]
        wv = p["wqkv"][:, 2 * D:]
        wqkv.append(jnp.concatenate([wq, wk, wv], axis=1))
        bq.append(p["bqkv"][:, :D] * scale)
        bv = p["bqkv"][:, 2 * D:]
        bo.append(p["bo"] + bv @ p["wo"])       # sum_k p == 1  =>  bv contributes bv @ wo
        wo.append(p["wo"])
    tok_pad = jnp.zeros((VP, D), jnp.float32).at[:V, :].set(params["tok_emb"])
    return {
        "tok_emb": tok_pad.astype(jnp.bfloat16),
        "pos_emb": jnp.tile(params["pos_emb"], (B, 1)),          # (BS, D) f32
        "emb_g": params["emb_g"],
        "emb_b": params["emb_b"],
        "wqkv": jnp.stack(wqkv).astype(jnp.bfloat16),            # (L, D, 3D)
        "bq": jnp.stack(bq),                                     # (L, 1, D)
        "wo": jnp.stack(wo).astype(jnp.bfloat16),                # (L, D, D)
        "bo": jnp.stack(bo),                                     # (L, 1, D) with bv folded in
        "g1": jnp.stack([p["g1"] for p in layers]),
        "be1": jnp.stack([p["be1"] for p in layers]),
        "w1": jnp.stack([p["w1"] for p in layers]).astype(jnp.bfloat16),
        "bb1": jnp.stack([p["bb1"] for p in layers]),
        "w2": jnp.stack([p["w2"] for p in layers]).astype(jnp.bfloat16),
        "bb2": jnp.stack([p["bb2"] for p in layers]),
        "g2": jnp.stack([p["g2"] for p in layers]),
        "be2": jnp.stack([p["be2"] for p in layers]),
    }


# ----------------------------- pure-JAX reference -------------------------------
def _ref_forward(ids, mask, params):
    x = jnp.take(params["tok_emb"], ids, axis=0) + params["pos_emb"][None]
    x = _layernorm(x, params["emb_g"], params["emb_b"])
    bias = (mask[:, None, :] - 1.0) * 1e9
    scale = 1.0 / math.sqrt(DH)
    for p in params["layers"]:
        qkv = x @ p["wqkv"] + p["bqkv"]
        heads = []
        for h in range(H):
            qh = qkv[..., h * DH:(h + 1) * DH]
            kh = qkv[..., D + h * DH:D + (h + 1) * DH]
            vh = qkv[..., 2 * D + h * DH:2 * D + (h + 1) * DH]
            s = jnp.einsum("bqd,bkd->bqk", qh, kh) * scale + bias
            pmat = jax.nn.softmax(s, axis=-1)
            heads.append(jnp.einsum("bqk,bkd->bqd", pmat, vh))
        ctx = jnp.concatenate(heads, axis=-1)
        h1 = _layernorm(x + ctx @ p["wo"] + p["bo"], p["g1"], p["be1"])
        ff = _gelu(h1 @ p["w1"] + p["bb1"]) @ p["w2"] + p["bb2"]
        x = _layernorm(h1 + ff, p["g2"], p["be2"])
    m = mask[..., None]
    return jnp.sum(x * m, axis=1) / jnp.maximum(jnp.sum(m, axis=1), 1.0)


# ----------------------------- main ---------------------------------------------
if __name__ == "__main__":
    key = jax.random.PRNGKey(0)
    k_ids, k_par = jax.random.split(key)

    # Synthetic "tokenized texts": token ids + padding mask (lengths 8 and 5).
    ids = jax.random.randint(k_ids, (B, S), 1, V, dtype=jnp.int32)
    lengths = jnp.array([8, 5], dtype=jnp.int32)
    mask = (jnp.arange(S)[None, :] < lengths[:, None]).astype(jnp.float32)
    ids = ids * mask.astype(jnp.int32)   # pad token id = 0

    params = init_params(k_par)
    packed = pack_params(params)

    emb = language_encoder_forward(ids, mask, packed)
    emb = jax.block_until_ready(emb)

    ref = _ref_forward(ids, mask, params)
    assert emb.shape == (B, D)
    assert jnp.allclose(emb, ref, atol=2e-2, rtol=2e-2)

    print("KERNEL_OK")
</pallas_src>

<mosaic_0001>
module attributes {stable_mosaic.version = 11 : i64} {
  func.func @encoder_kernel(%arg0: memref<16x1xi32, #tpu.memory_space<vmem>>, %arg1: memref<16x16xf32, #tpu.memory_space<vmem>>, %arg2: memref<2x16xf32, #tpu.memory_space<vmem>>, %arg3: memref<128x32xbf16, #tpu.memory_space<vmem>>, %arg4: memref<16x32xf32, #tpu.memory_space<vmem>>, %arg5: memref<1x32xf32, #tpu.memory_space<vmem>>, %arg6: memref<1x32xf32, #tpu.memory_space<vmem>>, %arg7: memref<2x32x96xbf16, #tpu.memory_space<vmem>>, %arg8: memref<2x1x32xf32, #tpu.memory_space<vmem>>, %arg9: memref<2x32x32xbf16, #tpu.memory_space<vmem>>, %arg10: memref<2x1x32xf32, #tpu.memory_space<vmem>>, %arg11: memref<2x1x32xf32, #tpu.memory_space<vmem>>, %arg12: memref<2x1x32xf32, #tpu.memory_space<vmem>>, %arg13: memref<2x32x64xbf16, #tpu.memory_space<vmem>>, %arg14: memref<2x1x64xf32, #tpu.memory_space<vmem>>, %arg15: memref<2x64x32xbf16, #tpu.memory_space<vmem>>, %arg16: memref<2x1x32xf32, #tpu.memory_space<vmem>>, %arg17: memref<2x1x32xf32, #tpu.memory_space<vmem>>, %arg18: memref<2x1x32xf32, #tpu.memory_space<vmem>>, %arg19: memref<2x32xf32, #tpu.memory_space<vmem>>) attributes {dimension_semantics = [], scalar_prefetch = 0 : i64, scratch_operands = 0 : i64, tpu.core_type = #tpu.core_type<tc>} {
    %c0 = arith.constant 0 : index
    %c0_0 = arith.constant 0 : index
    %0 = vector.load %arg0[%c0, %c0_0] : memref<16x1xi32, #tpu.memory_space<vmem>>, vector<16x1xi32>
    %1 = tpu.iota {dimensions = array<i32: 1>} : vector<16x128xi32>
    %2 = vector.broadcast %0 : vector<16x1xi32> to vector<16x128xi32>
    %3 = arith.cmpi eq, %2, %1 : vector<16x128xi32>
    %cst = arith.constant 1.000000e+00 : f32
    %cst_1 = arith.constant 0.000000e+00 : f32
    %4 = vector.broadcast %cst : f32 to vector<16x128xf32>
    %5 = vector.broadcast %cst_1 : f32 to vector<16x128xf32>
    %6 = arith.select %3, %4, %5 : vector<16x128xi1>, vector<16x128xf32>
    %7 = arith.truncf %6 : vector<16x128xf32> to vector<16x128xbf16>
    %c0_2 = arith.constant 0 : index
    %c0_3 = arith.constant 0 : index
    %8 = vector.load %arg3[%c0_2, %c0_3] : memref<128x32xbf16, #tpu.memory_space<vmem>>, vector<128x32xbf16>
    %cst_4 = arith.constant dense<0.000000e+00> : vector<16x32xf32>
    %9 = tpu.matmul %7, %8, %cst_4 {dimension_numbers = #tpu.dot_dimension_numbers<[1], [0], [0], [1], [0, 0, 1, 1], [], []>} : vector<16x128xbf16>, vector<128x32xbf16>, vector<16x32xf32> -> vector<16x32xf32>
    %c0_5 = arith.constant 0 : index
    %c0_6 = arith.constant 0 : index
    %10 = vector.load %arg4[%c0_5, %c0_6] : memref<16x32xf32, #tpu.memory_space<vmem>>, vector<16x32xf32>
    %11 = arith.addf %9, %10 : vector<16x32xf32>
    %c0_7 = arith.constant 0 : index
    %c0_8 = arith.constant 0 : index
    %12 = vector.load %arg5[%c0_7, %c0_8] : memref<1x32xf32, #tpu.memory_space<vmem>>, vector<1x32xf32>
    %c0_9 = arith.constant 0 : index
    %c0_10 = arith.constant 0 : index
    %13 = vector.load %arg6[%c0_9, %c0_10] : memref<1x32xf32, #tpu.memory_space<vmem>>, vector<1x32xf32>
    %cst_11 = arith.constant dense<0.000000e+00> : vector<16xf32>
    %14 = vector.multi_reduction <add>, %11, %cst_11 [1] : vector<16x32xf32> to vector<16xf32>
    %15 = vector.shape_cast %14 : vector<16xf32> to vector<16x1xf32>
    %cst_12 = arith.constant 3.200000e+01 : f32
    %16 = vector.broadcast %cst_12 : f32 to vector<16x1xf32>
    %17 = arith.divf %15, %16 : vector<16x1xf32>
    %18 = vector.broadcast %17 : vector<16x1xf32> to vector<16x32xf32>
    %19 = arith.subf %11, %18 : vector<16x32xf32>
    %20 = arith.mulf %19, %19 : vector<16x32xf32>
    %cst_13 = arith.constant dense<0.000000e+00> : vector<16xf32>
    %21 = vector.multi_reduction <add>, %20, %cst_13 [1] : vector<16x32xf32> to vector<16xf32>
    %22 = vector.shape_cast %21 : vector<16xf32> to vector<16x1xf32>
    %cst_14 = arith.constant 3.200000e+01 : f32
    %23 = vector.broadcast %cst_14 : f32 to vector<16x1xf32>
    %24 = arith.divf %22, %23 : vector<16x1xf32>
    %25 = vector.broadcast %17 : vector<16x1xf32> to vector<16x32xf32>
    %26 = arith.subf %11, %25 : vector<16x32xf32>
    %cst_15 = arith.constant 9.99999974E-6 : f32
    %27 = vector.broadcast %cst_15 : f32 to vector<16x1xf32>
    %28 = arith.addf %24, %27 : vector<16x1xf32>
    %29 = math.rsqrt %28 : vector<16x1xf32>
    %30 = vector.broadcast %29 : vector<16x1xf32> to vector<16x32xf32>
    %31 = arith.mulf %26, %30 : vector<16x32xf32>
    %32 = vector.broadcast %12 : vector<1x32xf32> to vector<16x32xf32>
    %33 = arith.mulf %31, %32 : vector<16x32xf32>
    %34 = vector.broadcast %13 : vector<1x32xf32> to vector<16x32xf32>
    %35 = arith.addf %33, %34 : vector<16x32xf32>
    %c0_16 = arith.constant 0 : index
    %c0_17 = arith.constant 0 : index
    %36 = vector.load %arg1[%c0_16, %c0_17] : memref<16x16xf32, #tpu.memory_space<vmem>>, vector<16x16xf32>
    %37 = arith.truncf %35 : vector<16x32xf32> to vector<16x32xbf16>
    %c0_18 = arith.constant 0 : index
    %c0_19 = arith.constant 0 : index
    %c0_20 = arith.constant 0 : index
    %38 = vector.load %arg7[%c0_18, %c0_19, %c0_20] : memref<2x32x96xbf16, #tpu.memory_space<vmem>>, vector<1x32x96xbf16>
    %39 = vector.shape_cast %38 : vector<1x32x96xbf16> to vector<32x96xbf16>
    %cst_21 = arith.constant dense<0.000000e+00> : vector<16x96xf32>
    %40 = tpu.matmul %37, %39, %cst_21 {dimension_numbers = #tpu.dot_dimension_numbers<[1], [0], [0], [1], [0, 0, 1, 1], [], []>} : vector<16x32xbf16>, vector<32x96xbf16>, vector<16x96xf32> -> vector<16x96xf32>
    %41 = vector.extract_strided_slice %40 {offsets = [0, 0], sizes = [16, 32], strides = [1, 1]} : vector<16x96xf32> to vector<16x32xf32>
    %c0_22 = arith.constant 0 : index
    %c0_23 = arith.constant 0 : index
    %c0_24 = arith.constant 0 : index
    %42 = vector.load %arg8[%c0_22, %c0_23, %c0_24] : memref<2x1x32xf32, #tpu.memory_space<vmem>>, vector<1x1x32xf32>
    %43 = vector.shape_cast %42 : vector<1x1x32xf32> to vector<1x32xf32>
    %44 = vector.broadcast %43 : vector<1x32xf32> to vector<16x32xf32>
    %45 = arith.addf %41, %44 : vector<16x32xf32>
    %46 = vector.extract_strided_slice %40 {offsets = [0, 32], sizes = [16, 32], strides = [1, 1]} : vector<16x96xf32> to vector<16x32xf32>
    %47 = vector.extract_strided_slice %40 {offsets = [0, 64], sizes = [16, 32], strides = [1, 1]} : vector<16x96xf32> to vector<16x32xf32>
    %48 = vector.extract_strided_slice %45 {offsets = [0, 0], sizes = [16, 8], strides = [1, 1]} : vector<16x32xf32> to vector<16x8xf32>
    %49 = vector.extract_strided_slice %46 {offsets = [0, 0], sizes = [16, 8], strides = [1, 1]} : vector<16x32xf32> to vector<16x8xf32>
    %50 = tpu.transpose %49, [1, 0] : vector<16x8xf32> -> vector<8x16xf32>
    %cst_25 = arith.constant dense<0.000000e+00> : vector<16x16xf32>
    %51 = tpu.matmul %48, %50, %cst_25 {dimension_numbers = #tpu.dot_dimension_numbers<[1], [0], [0], [1], [0, 0, 1, 1], [], []>} : vector<16x8xf32>, vector<8x16xf32>, vector<16x16xf32> -> vector<16x16xf32>
    %52 = arith.addf %51, %36 : vector<16x16xf32>
    %cst_26 = arith.constant dense<0xFF800000> : vector<16xf32>
    %53 = vector.multi_reduction <maximumf>, %52, %cst_26 [1] : vector<16x16xf32> to vector<16xf32>
    %54 = vector.shape_cast %53 : vector<16xf32> to vector<16x1xf32>
    %55 = vector.broadcast %54 : vector<16x1xf32> to vector<16x16xf32>
    %56 = arith.subf %52, %55 : vector<16x16xf32>
    %57 = math.exp %56 : vector<16x16xf32>
    %cst_27 = arith.constant dense<0.000000e+00> : vector<16xf32>
    %58 = vector.multi_reduction <add>, %57, %cst_27 [1] : vector<16x16xf32> to vector<16xf32>
    %59 = vector.shape_cast %58 : vector<16xf32> to vector<16x1xf32>
    %60 = tpu.reciprocal %59 {approx = true} : vector<16x1xf32> -> vector<16x1xf32>
    %61 = vector.broadcast %60 : vector<16x1xf32> to vector<16x16xf32>
    %62 = arith.mulf %57, %61 : vector<16x16xf32>
    %63 = vector.extract_strided_slice %47 {offsets = [0, 0], sizes = [16, 8], strides = [1, 1]} : vector<16x32xf32> to vector<16x8xf32>
    %cst_28 = arith.constant dense<0.000000e+00> : vector<16x8xf32>
    %64 = tpu.matmul %62, %63, %cst_28 {dimension_numbers = #tpu.dot_dimension_numbers<[1], [0], [0], [1], [0, 0, 1, 1], [], []>} : vector<16x16xf32>, vector<16x8xf32>, vector<16x8xf32> -> vector<16x8xf32>
    %65 = vector.extract_strided_slice %45 {offsets = [0, 8], sizes = [16, 8], strides = [1, 1]} : vector<16x32xf32> to vector<16x8xf32>
    %66 = vector.extract_strided_slice %46 {offsets = [0, 8], sizes = [16, 8], strides = [1, 1]} : vector<16x32xf32> to vector<16x8xf32>
    %67 = tpu.transpose %66, [1, 0] : vector<16x8xf32> -> vector<8x16xf32>
    %cst_29 = arith.constant dense<0.000000e+00> : vector<16x16xf32>
    %68 = tpu.matmul %65, %67, %cst_29 {dimension_numbers = #tpu.dot_dimension_numbers<[1], [0], [0], [1], [0, 0, 1, 1], [], []>} : vector<16x8xf32>, vector<8x16xf32>, vector<16x16xf32> -> vector<16x16xf32>
    %69 = arith.addf %68, %36 : vector<16x16xf32>
    %cst_30 = arith.constant dense<0xFF800000> : vector<16xf32>
    %70 = vector.multi_reduction <maximumf>, %69, %cst_30 [1] : vector<16x16xf32> to vector<16xf32>
    %71 = vector.shape_cast %70 : vector<16xf32> to vector<16x1xf32>
    %72 = vector.broadcast %71 : vector<16x1xf32> to vector<16x16xf32>
    %73 = arith.subf %69, %72 : vector<16x16xf32>
    %74 = math.exp %73 : vector<16x16xf32>
    %cst_31 = arith.constant dense<0.000000e+00> : vector<16xf32>
    %75 = vector.multi_reduction <add>, %74, %cst_31 [1] : vector<16x16xf32> to vector<16xf32>
    %76 = vector.shape_cast %75 : vector<16xf32> to vector<16x1xf32>
    %77 = tpu.reciprocal %76 {approx = true} : vector<16x1xf32> -> vector<16x1xf32>
    %78 = vector.broadcast %77 : vector<16x1xf32> to vector<16x16xf32>
    %79 = arith.mulf %74, %78 : vector<16x16xf32>
    %80 = vector.extract_strided_slice %47 {offsets = [0, 8], sizes = [16, 8], strides = [1, 1]} : vector<16x32xf32> to vector<16x8xf32>
    %cst_32 = arith.constant dense<0.000000e+00> : vector<16x8xf32>
    %81 = tpu.matmul %79, %80, %cst_32 {dimension_numbers = #tpu.dot_dimension_numbers<[1], [0], [0], [1], [0, 0, 1, 1], [], []>} : vector<16x16xf32>, vector<16x8xf32>, vector<16x8xf32> -> vector<16x8xf32>
    %82 = vector.extract_strided_slice %45 {offsets = [0, 16], sizes = [16, 8], strides = [1, 1]} : vector<16x32xf32> to vector<16x8xf32>
    %83 = vector.extract_strided_slice %46 {offsets = [0, 16], sizes = [16, 8], strides = [1, 1]} : vector<16x32xf32> to vector<16x8xf32>
    %84 = tpu.transpose %83, [1, 0] : vector<16x8xf32> -> vector<8x16xf32>
    %cst_33 = arith.constant dense<0.000000e+00> : vector<16x16xf32>
    %85 = tpu.matmul %82, %84, %cst_33 {dimension_numbers = #tpu.dot_dimension_numbers<[1], [0], [0], [1], [0, 0, 1, 1], [], []>} : vector<16x8xf32>, vector<8x16xf32>, vector<16x16xf32> -> vector<16x16xf32>
    %86 = arith.addf %85, %36 : vector<16x16xf32>
    %cst_34 = arith.constant dense<0xFF800000> : vector<16xf32>
    %87 = vector.multi_reduction <maximumf>, %86, %cst_34 [1] : vector<16x16xf32> to vector<16xf32>
    %88 = vector.shape_cast %87 : vector<16xf32> to vector<16x1xf32>
    %89 = vector.broadcast %88 : vector<16x1xf32> to vector<16x16xf32>
    %90 = arith.subf %86, %89 : vector<16x16xf32>
    %91 = math.exp %90 : vector<16x16xf32>
    %cst_35 = arith.constant dense<0.000000e+00> : vector<16xf32>
    %92 = vector.multi_reduction <add>, %91, %cst_35 [1] : vector<16x16xf32> to vector<16xf32>
    %93 = vector.shape_cast %92 : vector<16xf32> to vector<16x1xf32>
    %94 = tpu.reciprocal %93 {approx = true} : vector<16x1xf32> -> vector<16x1xf32>
    %95 = vector.broadcast %94 : vector<16x1xf32> to vector<16x16xf32>
    %96 = arith.mulf %91, %95 : vector<16x16xf32>
    %97 = vector.extract_strided_slice %47 {offsets = [0, 16], sizes = [16, 8], strides = [1, 1]} : vector<16x32xf32> to vector<16x8xf32>
    %cst_36 = arith.constant dense<0.000000e+00> : vector<16x8xf32>
    %98 = tpu.matmul %96, %97, %cst_36 {dimension_numbers = #tpu.dot_dimension_numbers<[1], [0], [0], [1], [0, 0, 1, 1], [], []>} : vector<16x16xf32>, vector<16x8xf32>, vector<16x8xf32> -> vector<16x8xf32>
    %99 = vector.extract_strided_slice %45 {offsets = [0, 24], sizes = [16, 8], strides = [1, 1]} : vector<16x32xf32> to vector<16x8xf32>
    %100 = vector.extract_strided_slice %46 {offsets = [0, 24], sizes = [16, 8], strides = [1, 1]} : vector<16x32xf32> to vector<16x8xf32>
    %101 = tpu.transpose %100, [1, 0] : vector<16x8xf32> -> vector<8x16xf32>
    %cst_37 = arith.constant dense<0.000000e+00> : vector<16x16xf32>
    %102 = tpu.matmul %99, %101, %cst_37 {dimension_numbers = #tpu.dot_dimension_numbers<[1], [0], [0], [1], [0, 0, 1, 1], [], []>} : vector<16x8xf32>, vector<8x16xf32>, vector<16x16xf32> -> vector<16x16xf32>
    %103 = arith.addf %102, %36 : vector<16x16xf32>
    %cst_38 = arith.constant dense<0xFF800000> : vector<16xf32>
    %104 = vector.multi_reduction <maximumf>, %103, %cst_38 [1] : vector<16x16xf32> to vector<16xf32>
    %105 = vector.shape_cast %104 : vector<16xf32> to vector<16x1xf32>
    %106 = vector.broadcast %105 : vector<16x1xf32> to vector<16x16xf32>
    %107 = arith.subf %103, %106 : vector<16x16xf32>
    %108 = math.exp %107 : vector<16x16xf32>
    %cst_39 = arith.constant dense<0.000000e+00> : vector<16xf32>
    %109 = vector.multi_reduction <add>, %108, %cst_39 [1] : vector<16x16xf32> to vector<16xf32>
    %110 = vector.shape_cast %109 : vector<16xf32> to vector<16x1xf32>
    %111 = tpu.reciprocal %110 {approx = true} : vector<16x1xf32> -> vector<16x1xf32>
    %112 = vector.broadcast %111 : vector<16x1xf32> to vector<16x16xf32>
    %113 = arith.mulf %108, %112 : vector<16x16xf32>
    %114 = vector.extract_strided_slice %47 {offsets = [0, 24], sizes = [16, 8], strides = [1, 1]} : vector<16x32xf32> to vector<16x8xf32>
    %cst_40 = arith.constant dense<0.000000e+00> : vector<16x8xf32>
    %115 = tpu.matmul %113, %114, %cst_40 {dimension_numbers = #tpu.dot_dimension_numbers<[1], [0], [0], [1], [0, 0, 1, 1], [], []>} : vector<16x16xf32>, vector<16x8xf32>, vector<16x8xf32> -> vector<16x8xf32>
    %116 = tpu.concatenate %64, %81, %98, %115 in 1 : vector<16x8xf32>, vector<16x8xf32>, vector<16x8xf32>, vector<16x8xf32> -> vector<16x32xf32>
    %117 = arith.truncf %116 : vector<16x32xf32> to vector<16x32xbf16>
    %c0_41 = arith.constant 0 : index
    %c0_42 = arith.constant 0 : index
    %c0_43 = arith.constant 0 : index
    %118 = vector.load %arg9[%c0_41, %c0_42, %c0_43] : memref<2x32x32xbf16, #tpu.memory_space<vmem>>, vector<1x32x32xbf16>
    %119 = vector.shape_cast %118 : vector<1x32x32xbf16> to vector<32x32xbf16>
    %cst_44 = arith.constant dense<0.000000e+00> : vector<16x32xf32>
    %120 = tpu.matmul %117, %119, %cst_44 {dimension_numbers = #tpu.dot_dimension_numbers<[1], [0], [0], [1], [0, 0, 1, 1], [], []>} : vector<16x32xbf16>, vector<32x32xbf16>, vector<16x32xf32> -> vector<16x32xf32>
    %c0_45 = arith.constant 0 : index
    %c0_46 = arith.constant 0 : index
    %c0_47 = arith.constant 0 : index
    %121 = vector.load %arg10[%c0_45, %c0_46, %c0_47] : memref<2x1x32xf32, #tpu.memory_space<vmem>>, vector<1x1x32xf32>
    %122 = vector.shape_cast %121 : vector<1x1x32xf32> to vector<1x32xf32>
    %123 = vector.broadcast %122 : vector<1x32xf32> to vector<16x32xf32>
    %124 = arith.addf %120, %123 : vector<16x32xf32>
    %125 = arith.addf %35, %124 : vector<16x32xf32>
    %c0_48 = arith.constant 0 : index
    %c0_49 = arith.constant 0 : index
    %c0_50 = arith.constant 0 : index
    %126 = vector.load %arg11[%c0_48, %c0_49, %c0_50] : memref<2x1x32xf32, #tpu.memory_space<vmem>>, vector<1x1x32xf32>
    %127 = vector.shape_cast %126 : vector<1x1x32xf32> to vector<1x32xf32>
    %c0_51 = arith.constant 0 : index
    %c0_52 = arith.constant 0 : index
    %c0_53 = arith.constant 0 : index
    %128 = vector.load %arg12[%c0_51, %c0_52, %c0_53] : memref<2x1x32xf32, #tpu.memory_space<vmem>>, vector<1x1x32xf32>
    %129 = vector.shape_cast %128 : vector<1x1x32xf32> to vector<1x32xf32>
    %cst_54 = arith.constant dense<0.000000e+00> : vector<16xf32>
    %130 = vector.multi_reduction <add>, %125, %cst_54 [1] : vector<16x32xf32> to vector<16xf32>
    %131 = vector.shape_cast %130 : vector<16xf32> to vector<16x1xf32>
    %cst_55 = arith.constant 3.200000e+01 : f32
    %132 = vector.broadcast %cst_55 : f32 to vector<16x1xf32>
    %133 = arith.divf %131, %132 : vector<16x1xf32>
    %134 = vector.broadcast %133 : vector<16x1xf32> to vector<16x32xf32>
    %135 = arith.subf %125, %134 : vector<16x32xf32>
    %136 = arith.mulf %135, %135 : vector<16x32xf32>
    %cst_56 = arith.constant dense<0.000000e+00> : vector<16xf32>
    %137 = vector.multi_reduction <add>, %136, %cst_56 [1] : vector<16x32xf32> to vector<16xf32>
    %138 = vector.shape_cast %137 : vector<16xf32> to vector<16x1xf32>
    %cst_57 = arith.constant 3.200000e+01 : f32
    %139 = vector.broadcast %cst_57 : f32 to vector<16x1xf32>
    %140 = arith.divf %138, %139 : vector<16x1xf32>
    %141 = vector.broadcast %133 : vector<16x1xf32> to vector<16x32xf32>
    %142 = arith.subf %125, %141 : vector<16x32xf32>
    %cst_58 = arith.constant 9.99999974E-6 : f32
    %143 = vector.broadcast %cst_58 : f32 to vector<16x1xf32>
    %144 = arith.addf %140, %143 : vector<16x1xf32>
    %145 = math.rsqrt %144 : vector<16x1xf32>
    %146 = vector.broadcast %145 : vector<16x1xf32> to vector<16x32xf32>
    %147 = arith.mulf %142, %146 : vector<16x32xf32>
    %148 = vector.broadcast %127 : vector<1x32xf32> to vector<16x32xf32>
    %149 = arith.mulf %147, %148 : vector<16x32xf32>
    %150 = vector.broadcast %129 : vector<1x32xf32> to vector<16x32xf32>
    %151 = arith.addf %149, %150 : vector<16x32xf32>
    %152 = arith.truncf %151 : vector<16x32xf32> to vector<16x32xbf16>
    %c0_59 = arith.constant 0 : index
    %c0_60 = arith.constant 0 : index
    %c0_61 = arith.constant 0 : index
    %153 = vector.load %arg13[%c0_59, %c0_60, %c0_61] : memref<2x32x64xbf16, #tpu.memory_space<vmem>>, vector<1x32x64xbf16>
    %154 = vector.shape_cast %153 : vector<1x32x64xbf16> to vector<32x64xbf16>
    %cst_62 = arith.constant dense<0.000000e+00> : vector<16x64xf32>
    %155 = tpu.matmul %152, %154, %cst_62 {dimension_numbers = #tpu.dot_dimension_numbers<[1], [0], [0], [1], [0, 0, 1, 1], [], []>} : vector<16x32xbf16>, vector<32x64xbf16>, vector<16x64xf32> -> vector<16x64xf32>
    %c0_63 = arith.constant 0 : index
    %c0_64 = arith.constant 0 : index
    %c0_65 = arith.constant 0 : index
    %156 = vector.load %arg14[%c0_63, %c0_64, %c0_65] : memref<2x1x64xf32, #tpu.memory_space<vmem>>, vector<1x1x64xf32>
    %157 = vector.shape_cast %156 : vector<1x1x64xf32> to vector<1x64xf32>
    %158 = vector.broadcast %157 : vector<1x64xf32> to vector<16x64xf32>
    %159 = arith.addf %155, %158 : vector<16x64xf32>
    %cst_66 = arith.constant 5.000000e-01 : f32
    %160 = vector.broadcast %cst_66 : f32 to vector<16x64xf32>
    %161 = arith.mulf %160, %159 : vector<16x64xf32>
    %cst_67 = arith.constant 4.471500e-02 : f32
    %162 = vector.broadcast %cst_67 : f32 to vector<16x64xf32>
    %163 = arith.mulf %162, %159 : vector<16x64xf32>
    %164 = arith.mulf %163, %159 : vector<16x64xf32>
    %165 = arith.mulf %164, %159 : vector<16x64xf32>
    %166 = arith.addf %159, %165 : vector<16x64xf32>
    %cst_68 = arith.constant 0.797884583 : f32
    %167 = vector.broadcast %cst_68 : f32 to vector<16x64xf32>
    %168 = arith.mulf %167, %166 : vector<16x64xf32>
    %169 = math.tanh %168 : vector<16x64xf32>
    %cst_69 = arith.constant 1.000000e+00 : f32
    %170 = vector.broadcast %cst_69 : f32 to vector<16x64xf32>
    %171 = arith.addf %170, %169 : vector<16x64xf32>
    %172 = arith.mulf %161, %171 : vector<16x64xf32>
    %173 = arith.truncf %172 : vector<16x64xf32> to vector<16x64xbf16>
    %c0_70 = arith.constant 0 : index
    %c0_71 = arith.constant 0 : index
    %c0_72 = arith.constant 0 : index
    %174 = vector.load %arg15[%c0_70, %c0_71, %c0_72] : memref<2x64x32xbf16, #tpu.memory_space<vmem>>, vector<1x64x32xbf16>
    %175 = vector.shape_cast %174 : vector<1x64x32xbf16> to vector<64x32xbf16>
    %cst_73 = arith.constant dense<0.000000e+00> : vector<16x32xf32>
    %176 = tpu.matmul %173, %175, %cst_73 {dimension_numbers = #tpu.dot_dimension_numbers<[1], [0], [0], [1], [0, 0, 1, 1], [], []>} : vector<16x64xbf16>, vector<64x32xbf16>, vector<16x32xf32> -> vector<16x32xf32>
    %c0_74 = arith.constant 0 : index
    %c0_75 = arith.constant 0 : index
    %c0_76 = arith.constant 0 : index
    %177 = vector.load %arg16[%c0_74, %c0_75, %c0_76] : memref<2x1x32xf32, #tpu.memory_space<vmem>>, vector<1x1x32xf32>
    %178 = vector.shape_cast %177 : vector<1x1x32xf32> to vector<1x32xf32>
    %179 = vector.broadcast %178 : vector<1x32xf32> to vector<16x32xf32>
    %180 = arith.addf %176, %179 : vector<16x32xf32>
    %181 = arith.addf %151, %180 : vector<16x32xf32>
    %c0_77 = arith.constant 0 : index
    %c0_78 = arith.constant 0 : index
    %c0_79 = arith.constant 0 : index
    %182 = vector.load %arg17[%c0_77, %c0_78, %c0_79] : memref<2x1x32xf32, #tpu.memory_space<vmem>>, vector<1x1x32xf32>
    %183 = vector.shape_cast %182 : vector<1x1x32xf32> to vector<1x32xf32>
    %c0_80 = arith.constant 0 : index
    %c0_81 = arith.constant 0 : index
    %c0_82 = arith.constant 0 : index
    %184 = vector.load %arg18[%c0_80, %c0_81, %c0_82] : memref<2x1x32xf32, #tpu.memory_space<vmem>>, vector<1x1x32xf32>
    %185 = vector.shape_cast %184 : vector<1x1x32xf32> to vector<1x32xf32>
    %cst_83 = arith.constant dense<0.000000e+00> : vector<16xf32>
    %186 = vector.multi_reduction <add>, %181, %cst_83 [1] : vector<16x32xf32> to vector<16xf32>
    %187 = vector.shape_cast %186 : vector<16xf32> to vector<16x1xf32>
    %cst_84 = arith.constant 3.200000e+01 : f32
    %188 = vector.broadcast %cst_84 : f32 to vector<16x1xf32>
    %189 = arith.divf %187, %188 : vector<16x1xf32>
    %190 = vector.broadcast %189 : vector<16x1xf32> to vector<16x32xf32>
    %191 = arith.subf %181, %190 : vector<16x32xf32>
    %192 = arith.mulf %191, %191 : vector<16x32xf32>
    %cst_85 = arith.constant dense<0.000000e+00> : vector<16xf32>
    %193 = vector.multi_reduction <add>, %192, %cst_85 [1] : vector<16x32xf32> to vector<16xf32>
    %194 = vector.shape_cast %193 : vector<16xf32> to vector<16x1xf32>
    %cst_86 = arith.constant 3.200000e+01 : f32
    %195 = vector.broadcast %cst_86 : f32 to vector<16x1xf32>
    %196 = arith.divf %194, %195 : vector<16x1xf32>
    %197 = vector.broadcast %189 : vector<16x1xf32> to vector<16x32xf32>
    %198 = arith.subf %181, %197 : vector<16x32xf32>
    %cst_87 = arith.constant 9.99999974E-6 : f32
    %199 = vector.broadcast %cst_87 : f32 to vector<16x1xf32>
    %200 = arith.addf %196, %199 : vector<16x1xf32>
    %201 = math.rsqrt %200 : vector<16x1xf32>
    %202 = vector.broadcast %201 : vector<16x1xf32> to vector<16x32xf32>
    %203 = arith.mulf %198, %202 : vector<16x32xf32>
    %204 = vector.broadcast %183 : vector<1x32xf32> to vector<16x32xf32>
    %205 = arith.mulf %203, %204 : vector<16x32xf32>
    %206 = vector.broadcast %185 : vector<1x32xf32> to vector<16x32xf32>
    %207 = arith.addf %205, %206 : vector<16x32xf32>
    %208 = arith.truncf %207 : vector<16x32xf32> to vector<16x32xbf16>
    %c1 = arith.constant 1 : index
    %c0_88 = arith.constant 0 : index
    %c0_89 = arith.constant 0 : index
    %209 = vector.load %arg7[%c1, %c0_88, %c0_89] : memref<2x32x96xbf16, #tpu.memory_space<vmem>>, vector<1x32x96xbf16>
    %210 = vector.shape_cast %209 : vector<1x32x96xbf16> to vector<32x96xbf16>
    %cst_90 = arith.constant dense<0.000000e+00> : vector<16x96xf32>
    %211 = tpu.matmul %208, %210, %cst_90 {dimension_numbers = #tpu.dot_dimension_numbers<[1], [0], [0], [1], [0, 0, 1, 1], [], []>} : vector<16x32xbf16>, vector<32x96xbf16>, vector<16x96xf32> -> vector<16x96xf32>
    %212 = vector.extract_strided_slice %211 {offsets = [0, 0], sizes = [16, 32], strides = [1, 1]} : vector<16x96xf32> to vector<16x32xf32>
    %c1_91 = arith.constant 1 : index
    %c0_92 = arith.constant 0 : index
    %c0_93 = arith.constant 0 : index
    %213 = vector.load %arg8[%c1_91, %c0_92, %c0_93] : memref<2x1x32xf32, #tpu.memory_space<vmem>>, vector<1x1x32xf32>
    %214 = vector.shape_cast %213 : vector<1x1x32xf32> to vector<1x32xf32>
    %215 = vector.broadcast %214 : vector<1x32xf32> to vector<16x32xf32>
    %216 = arith.addf %212, %215 : vector<16x32xf32>
    %217 = vector.extract_strided_slice %211 {offsets = [0, 32], sizes = [16, 32], strides = [1, 1]} : vector<16x96xf32> to vector<16x32xf32>
    %218 = vector.extract_strided_slice %211 {offsets = [0, 64], sizes = [16, 32], strides = [1, 1]} : vector<16x96xf32> to vector<16x32xf32>
    %219 = vector.extract_strided_slice %216 {offsets = [0, 0], sizes = [16, 8], strides = [1, 1]} : vector<16x32xf32> to vector<16x8xf32>
    %220 = vector.extract_strided_slice %217 {offsets = [0, 0], sizes = [16, 8], strides = [1, 1]} : vector<16x32xf32> to vector<16x8xf32>
    %221 = tpu.transpose %220, [1, 0] : vector<16x8xf32> -> vector<8x16xf32>
    %cst_94 = arith.constant dense<0.000000e+00> : vector<16x16xf32>
    %222 = tpu.matmul %219, %221, %cst_94 {dimension_numbers = #tpu.dot_dimension_numbers<[1], [0], [0], [1], [0, 0, 1, 1], [], []>} : vector<16x8xf32>, vector<8x16xf32>, vector<16x16xf32> -> vector<16x16xf32>
    %223 = arith.addf %222, %36 : vector<16x16xf32>
    %cst_95 = arith.constant dense<0xFF800000> : vector<16xf32>
    %224 = vector.multi_reduction <maximumf>, %223, %cst_95 [1] : vector<16x16xf32> to vector<16xf32>
    %225 = vector.shape_cast %224 : vector<16xf32> to vector<16x1xf32>
    %226 = vector.broadcast %225 : vector<16x1xf32> to vector<16x16xf32>
    %227 = arith.subf %223, %226 : vector<16x16xf32>
    %228 = math.exp %227 : vector<16x16xf32>
    %cst_96 = arith.constant dense<0.000000e+00> : vector<16xf32>
    %229 = vector.multi_reduction <add>, %228, %cst_96 [1] : vector<16x16xf32> to vector<16xf32>
    %230 = vector.shape_cast %229 : vector<16xf32> to vector<16x1xf32>
    %231 = tpu.reciprocal %230 {approx = true} : vector<16x1xf32> -> vector<16x1xf32>
    %232 = vector.broadcast %231 : vector<16x1xf32> to vector<16x16xf32>
    %233 = arith.mulf %228, %232 : vector<16x16xf32>
    %234 = vector.extract_strided_slice %218 {offsets = [0, 0], sizes = [16, 8], strides = [1, 1]} : vector<16x32xf32> to vector<16x8xf32>
    %cst_97 = arith.constant dense<0.000000e+00> : vector<16x8xf32>
    %235 = tpu.matmul %233, %234, %cst_97 {dimension_numbers = #tpu.dot_dimension_numbers<[1], [0], [0], [1], [0, 0, 1, 1], [], []>} : vector<16x16xf32>, vector<16x8xf32>, vector<16x8xf32> -> vector<16x8xf32>
    %236 = vector.extract_strided_slice %216 {offsets = [0, 8], sizes = [16, 8], strides = [1, 1]} : vector<16x32xf32> to vector<16x8xf32>
    %237 = vector.extract_strided_slice %217 {offsets = [0, 8], sizes = [16, 8], strides = [1, 1]} : vector<16x32xf32> to vector<16x8xf32>
    %238 = tpu.transpose %237, [1, 0] : vector<16x8xf32> -> vector<8x16xf32>
    %cst_98 = arith.constant dense<0.000000e+00> : vector<16x16xf32>
    %239 = tpu.matmul %236, %238, %cst_98 {dimension_numbers = #tpu.dot_dimension_numbers<[1], [0], [0], [1], [0, 0, 1, 1], [], []>} : vector<16x8xf32>, vector<8x16xf32>, vector<16x16xf32> -> vector<16x16xf32>
    %240 = arith.addf %239, %36 : vector<16x16xf32>
    %cst_99 = arith.constant dense<0xFF800000> : vector<16xf32>
    %241 = vector.multi_reduction <maximumf>, %240, %cst_99 [1] : vector<16x16xf32> to vector<16xf32>
    %242 = vector.shape_cast %241 : vector<16xf32> to vector<16x1xf32>
    %243 = vector.broadcast %242 : vector<16x1xf32> to vector<16x16xf32>
    %244 = arith.subf %240, %243 : vector<16x16xf32>
    %245 = math.exp %244 : vector<16x16xf32>
    %cst_100 = arith.constant dense<0.000000e+00> : vector<16xf32>
    %246 = vector.multi_reduction <add>, %245, %cst_100 [1] : vector<16x16xf32> to vector<16xf32>
    %247 = vector.shape_cast %246 : vector<16xf32> to vector<16x1xf32>
    %248 = tpu.reciprocal %247 {approx = true} : vector<16x1xf32> -> vector<16x1xf32>
    %249 = vector.broadcast %248 : vector<16x1xf32> to vector<16x16xf32>
    %250 = arith.mulf %245, %249 : vector<16x16xf32>
    %251 = vector.extract_strided_slice %218 {offsets = [0, 8], sizes = [16, 8], strides = [1, 1]} : vector<16x32xf32> to vector<16x8xf32>
    %cst_101 = arith.constant dense<0.000000e+00> : vector<16x8xf32>
    %252 = tpu.matmul %250, %251, %cst_101 {dimension_numbers = #tpu.dot_dimension_numbers<[1], [0], [0], [1], [0, 0, 1, 1], [], []>} : vector<16x16xf32>, vector<16x8xf32>, vector<16x8xf32> -> vector<16x8xf32>
    %253 = vector.extract_strided_slice %216 {offsets = [0, 16], sizes = [16, 8], strides = [1, 1]} : vector<16x32xf32> to vector<16x8xf32>
    %254 = vector.extract_strided_slice %217 {offsets = [0, 16], sizes = [16, 8], strides = [1, 1]} : vector<16x32xf32> to vector<16x8xf32>
    %255 = tpu.transpose %254, [1, 0] : vector<16x8xf32> -> vector<8x16xf32>
    %cst_102 = arith.constant dense<0.000000e+00> : vector<16x16xf32>
    %256 = tpu.matmul %253, %255, %cst_102 {dimension_numbers = #tpu.dot_dimension_numbers<[1], [0], [0], [1], [0, 0, 1, 1], [], []>} : vector<16x8xf32>, vector<8x16xf32>, vector<16x16xf32> -> vector<16x16xf32>
    %257 = arith.addf %256, %36 : vector<16x16xf32>
    %cst_103 = arith.constant dense<0xFF800000> : vector<16xf32>
    %258 = vector.multi_reduction <maximumf>, %257, %cst_103 [1] : vector<16x16xf32> to vector<16xf32>
    %259 = vector.shape_cast %258 : vector<16xf32> to vector<16x1xf32>
    %260 = vector.broadcast %259 : vector<16x1xf32> to vector<16x16xf32>
    %261 = arith.subf %257, %260 : vector<16x16xf32>
    %262 = math.exp %261 : vector<16x16xf32>
    %cst_104 = arith.constant dense<0.000000e+00> : vector<16xf32>
    %263 = vector.multi_reduction <add>, %262, %cst_104 [1] : vector<16x16xf32> to vector<16xf32>
    %264 = vector.shape_cast %263 : vector<16xf32> to vector<16x1xf32>
    %265 = tpu.reciprocal %264 {approx = true} : vector<16x1xf32> -> vector<16x1xf32>
    %266 = vector.broadcast %265 : vector<16x1xf32> to vector<16x16xf32>
    %267 = arith.mulf %262, %266 : vector<16x16xf32>
    %268 = vector.extract_strided_slice %218 {offsets = [0, 16], sizes = [16, 8], strides = [1, 1]} : vector<16x32xf32> to vector<16x8xf32>
    %cst_105 = arith.constant dense<0.000000e+00> : vector<16x8xf32>
    %269 = tpu.matmul %267, %268, %cst_105 {dimension_numbers = #tpu.dot_dimension_numbers<[1], [0], [0], [1], [0, 0, 1, 1], [], []>} : vector<16x16xf32>, vector<16x8xf32>, vector<16x8xf32> -> vector<16x8xf32>
    %270 = vector.extract_strided_slice %216 {offsets = [0, 24], sizes = [16, 8], strides = [1, 1]} : vector<16x32xf32> to vector<16x8xf32>
    %271 = vector.extract_strided_slice %217 {offsets = [0, 24], sizes = [16, 8], strides = [1, 1]} : vector<16x32xf32> to vector<16x8xf32>
    %272 = tpu.transpose %271, [1, 0] : vector<16x8xf32> -> vector<8x16xf32>
    %cst_106 = arith.constant dense<0.000000e+00> : vector<16x16xf32>
    %273 = tpu.matmul %270, %272, %cst_106 {dimension_numbers = #tpu.dot_dimension_numbers<[1], [0], [0], [1], [0, 0, 1, 1], [], []>} : vector<16x8xf32>, vector<8x16xf32>, vector<16x16xf32> -> vector<16x16xf32>
    %274 = arith.addf %273, %36 : vector<16x16xf32>
    %cst_107 = arith.constant dense<0xFF800000> : vector<16xf32>
    %275 = vector.multi_reduction <maximumf>, %274, %cst_107 [1] : vector<16x16xf32> to vector<16xf32>
    %276 = vector.shape_cast %275 : vector<16xf32> to vector<16x1xf32>
    %277 = vector.broadcast %276 : vector<16x1xf32> to vector<16x16xf32>
    %278 = arith.subf %274, %277 : vector<16x16xf32>
    %279 = math.exp %278 : vector<16x16xf32>
    %cst_108 = arith.constant dense<0.000000e+00> : vector<16xf32>
    %280 = vector.multi_reduction <add>, %279, %cst_108 [1] : vector<16x16xf32> to vector<16xf32>
    %281 = vector.shape_cast %280 : vector<16xf32> to vector<16x1xf32>
    %282 = tpu.reciprocal %281 {approx = true} : vector<16x1xf32> -> vector<16x1xf32>
    %283 = vector.broadcast %282 : vector<16x1xf32> to vector<16x16xf32>
    %284 = arith.mulf %279, %283 : vector<16x16xf32>
    %285 = vector.extract_strided_slice %218 {offsets = [0, 24], sizes = [16, 8], strides = [1, 1]} : vector<16x32xf32> to vector<16x8xf32>
    %cst_109 = arith.constant dense<0.000000e+00> : vector<16x8xf32>
    %286 = tpu.matmul %284, %285, %cst_109 {dimension_numbers = #tpu.dot_dimension_numbers<[1], [0], [0], [1], [0, 0, 1, 1], [], []>} : vector<16x16xf32>, vector<16x8xf32>, vector<16x8xf32> -> vector<16x8xf32>
    %287 = tpu.concatenate %235, %252, %269, %286 in 1 : vector<16x8xf32>, vector<16x8xf32>, vector<16x8xf32>, vector<16x8xf32> -> vector<16x32xf32>
    %288 = arith.truncf %287 : vector<16x32xf32> to vector<16x32xbf16>
    %c1_110 = arith.constant 1 : index
    %c0_111 = arith.constant 0 : index
    %c0_112 = arith.constant 0 : index
    %289 = vector.load %arg9[%c1_110, %c0_111, %c0_112] : memref<2x32x32xbf16, #tpu.memory_space<vmem>>, vector<1x32x32xbf16>
    %290 = vector.shape_cast %289 : vector<1x32x32xbf16> to vector<32x32xbf16>
    %cst_113 = arith.constant dense<0.000000e+00> : vector<16x32xf32>
    %291 = tpu.matmul %288, %290, %cst_113 {dimension_numbers = #tpu.dot_dimension_numbers<[1], [0], [0], [1], [0, 0, 1, 1], [], []>} : vector<16x32xbf16>, vector<32x32xbf16>, vector<16x32xf32> -> vector<16x32xf32>
    %c1_114 = arith.constant 1 : index
    %c0_115 = arith.constant 0 : index
    %c0_116 = arith.constant 0 : index
    %292 = vector.load %arg10[%c1_114, %c0_115, %c0_116] : memref<2x1x32xf32, #tpu.memory_space<vmem>>, vector<1x1x32xf32>
    %293 = vector.shape_cast %292 : vector<1x1x32xf32> to vector<1x32xf32>
    %294 = vector.broadcast %293 : vector<1x32xf32> to vector<16x32xf32>
    %295 = arith.addf %291, %294 : vector<16x32xf32>
    %296 = arith.addf %207, %295 : vector<16x32xf32>
    %c1_117 = arith.constant 1 : index
    %c0_118 = arith.constant 0 : index
    %c0_119 = arith.constant 0 : index
    %297 = vector.load %arg11[%c1_117, %c0_118, %c0_119] : memref<2x1x32xf32, #tpu.memory_space<vmem>>, vector<1x1x32xf32>
    %298 = vector.shape_cast %297 : vector<1x1x32xf32> to vector<1x32xf32>
    %c1_120 = arith.constant 1 : index
    %c0_121 = arith.constant 0 : index
    %c0_122 = arith.constant 0 : index
    %299 = vector.load %arg12[%c1_120, %c0_121, %c0_122] : memref<2x1x32xf32, #tpu.memory_space<vmem>>, vector<1x1x32xf32>
    %300 = vector.shape_cast %299 : vector<1x1x32xf32> to vector<1x32xf32>
    %cst_123 = arith.constant dense<0.000000e+00> : vector<16xf32>
    %301 = vector.multi_reduction <add>, %296, %cst_123 [1] : vector<16x32xf32> to vector<16xf32>
    %302 = vector.shape_cast %301 : vector<16xf32> to vector<16x1xf32>
    %cst_124 = arith.constant 3.200000e+01 : f32
    %303 = vector.broadcast %cst_124 : f32 to vector<16x1xf32>
    %304 = arith.divf %302, %303 : vector<16x1xf32>
    %305 = vector.broadcast %304 : vector<16x1xf32> to vector<16x32xf32>
    %306 = arith.subf %296, %305 : vector<16x32xf32>
    %307 = arith.mulf %306, %306 : vector<16x32xf32>
    %cst_125 = arith.constant dense<0.000000e+00> : vector<16xf32>
    %308 = vector.multi_reduction <add>, %307, %cst_125 [1] : vector<16x32xf32> to vector<16xf32>
    %309 = vector.shape_cast %308 : vector<16xf32> to vector<16x1xf32>
    %cst_126 = arith.constant 3.200000e+01 : f32
    %310 = vector.broadcast %cst_126 : f32 to vector<16x1xf32>
    %311 = arith.divf %309, %310 : vector<16x1xf32>
    %312 = vector.broadcast %304 : vector<16x1xf32> to vector<16x32xf32>
    %313 = arith.subf %296, %312 : vector<16x32xf32>
    %cst_127 = arith.constant 9.99999974E-6 : f32
    %314 = vector.broadcast %cst_127 : f32 to vector<16x1xf32>
    %315 = arith.addf %311, %314 : vector<16x1xf32>
    %316 = math.rsqrt %315 : vector<16x1xf32>
    %317 = vector.broadcast %316 : vector<16x1xf32> to vector<16x32xf32>
    %318 = arith.mulf %313, %317 : vector<16x32xf32>
    %319 = vector.broadcast %298 : vector<1x32xf32> to vector<16x32xf32>
    %320 = arith.mulf %318, %319 : vector<16x32xf32>
    %321 = vector.broadcast %300 : vector<1x32xf32> to vector<16x32xf32>
    %322 = arith.addf %320, %321 : vector<16x32xf32>
    %323 = arith.truncf %322 : vector<16x32xf32> to vector<16x32xbf16>
    %c1_128 = arith.constant 1 : index
    %c0_129 = arith.constant 0 : index
    %c0_130 = arith.constant 0 : index
    %324 = vector.load %arg13[%c1_128, %c0_129, %c0_130] : memref<2x32x64xbf16, #tpu.memory_space<vmem>>, vector<1x32x64xbf16>
    %325 = vector.shape_cast %324 : vector<1x32x64xbf16> to vector<32x64xbf16>
    %cst_131 = arith.constant dense<0.000000e+00> : vector<16x64xf32>
    %326 = tpu.matmul %323, %325, %cst_131 {dimension_numbers = #tpu.dot_dimension_numbers<[1], [0], [0], [1], [0, 0, 1, 1], [], []>} : vector<16x32xbf16>, vector<32x64xbf16>, vector<16x64xf32> -> vector<16x64xf32>
    %c1_132 = arith.constant 1 : index
    %c0_133 = arith.constant 0 : index
    %c0_134 = arith.constant 0 : index
    %327 = vector.load %arg14[%c1_132, %c0_133, %c0_134] : memref<2x1x64xf32, #tpu.memory_space<vmem>>, vector<1x1x64xf32>
    %328 = vector.shape_cast %327 : vector<1x1x64xf32> to vector<1x64xf32>
    %329 = vector.broadcast %328 : vector<1x64xf32> to vector<16x64xf32>
    %330 = arith.addf %326, %329 : vector<16x64xf32>
    %cst_135 = arith.constant 5.000000e-01 : f32
    %331 = vector.broadcast %cst_135 : f32 to vector<16x64xf32>
    %332 = arith.mulf %331, %330 : vector<16x64xf32>
    %cst_136 = arith.constant 4.471500e-02 : f32
    %333 = vector.broadcast %cst_136 : f32 to vector<16x64xf32>
    %334 = arith.mulf %333, %330 : vector<16x64xf32>
    %335 = arith.mulf %334, %330 : vector<16x64xf32>
    %336 = arith.mulf %335, %330 : vector<16x64xf32>
    %337 = arith.addf %330, %336 : vector<16x64xf32>
    %cst_137 = arith.constant 0.797884583 : f32
    %338 = vector.broadcast %cst_137 : f32 to vector<16x64xf32>
    %339 = arith.mulf %338, %337 : vector<16x64xf32>
    %340 = math.tanh %339 : vector<16x64xf32>
    %cst_138 = arith.constant 1.000000e+00 : f32
    %341 = vector.broadcast %cst_138 : f32 to vector<16x64xf32>
    %342 = arith.addf %341, %340 : vector<16x64xf32>
    %343 = arith.mulf %332, %342 : vector<16x64xf32>
    %344 = arith.truncf %343 : vector<16x64xf32> to vector<16x64xbf16>
    %c1_139 = arith.constant 1 : index
    %c0_140 = arith.constant 0 : index
    %c0_141 = arith.constant 0 : index
    %345 = vector.load %arg15[%c1_139, %c0_140, %c0_141] : memref<2x64x32xbf16, #tpu.memory_space<vmem>>, vector<1x64x32xbf16>
    %346 = vector.shape_cast %345 : vector<1x64x32xbf16> to vector<64x32xbf16>
    %cst_142 = arith.constant dense<0.000000e+00> : vector<16x32xf32>
    %347 = tpu.matmul %344, %346, %cst_142 {dimension_numbers = #tpu.dot_dimension_numbers<[1], [0], [0], [1], [0, 0, 1, 1], [], []>} : vector<16x64xbf16>, vector<64x32xbf16>, vector<16x32xf32> -> vector<16x32xf32>
    %c1_143 = arith.constant 1 : index
    %c0_144 = arith.constant 0 : index
    %c0_145 = arith.constant 0 : index
    %348 = vector.load %arg16[%c1_143, %c0_144, %c0_145] : memref<2x1x32xf32, #tpu.memory_space<vmem>>, vector<1x1x32xf32>
    %349 = vector.shape_cast %348 : vector<1x1x32xf32> to vector<1x32xf32>
    %350 = vector.broadcast %349 : vector<1x32xf32> to vector<16x32xf32>
    %351 = arith.addf %347, %350 : vector<16x32xf32>
    %352 = arith.addf %322, %351 : vector<16x32xf32>
    %c1_146 = arith.constant 1 : index
    %c0_147 = arith.constant 0 : index
    %c0_148 = arith.constant 0 : index
    %353 = vector.load %arg17[%c1_146, %c0_147, %c0_148] : memref<2x1x32xf32, #tpu.memory_space<vmem>>, vector<1x1x32xf32>
    %354 = vector.shape_cast %353 : vector<1x1x32xf32> to vector<1x32xf32>
    %c1_149 = arith.constant 1 : index
    %c0_150 = arith.constant 0 : index
    %c0_151 = arith.constant 0 : index
    %355 = vector.load %arg18[%c1_149, %c0_150, %c0_151] : memref<2x1x32xf32, #tpu.memory_space<vmem>>, vector<1x1x32xf32>
    %356 = vector.shape_cast %355 : vector<1x1x32xf32> to vector<1x32xf32>
    %cst_152 = arith.constant dense<0.000000e+00> : vector<16xf32>
    %357 = vector.multi_reduction <add>, %352, %cst_152 [1] : vector<16x32xf32> to vector<16xf32>
    %358 = vector.shape_cast %357 : vector<16xf32> to vector<16x1xf32>
    %cst_153 = arith.constant 3.200000e+01 : f32
    %359 = vector.broadcast %cst_153 : f32 to vector<16x1xf32>
    %360 = arith.divf %358, %359 : vector<16x1xf32>
    %361 = vector.broadcast %360 : vector<16x1xf32> to vector<16x32xf32>
    %362 = arith.subf %352, %361 : vector<16x32xf32>
    %363 = arith.mulf %362, %362 : vector<16x32xf32>
    %cst_154 = arith.constant dense<0.000000e+00> : vector<16xf32>
    %364 = vector.multi_reduction <add>, %363, %cst_154 [1] : vector<16x32xf32> to vector<16xf32>
    %365 = vector.shape_cast %364 : vector<16xf32> to vector<16x1xf32>
    %cst_155 = arith.constant 3.200000e+01 : f32
    %366 = vector.broadcast %cst_155 : f32 to vector<16x1xf32>
    %367 = arith.divf %365, %366 : vector<16x1xf32>
    %368 = vector.broadcast %360 : vector<16x1xf32> to vector<16x32xf32>
    %369 = arith.subf %352, %368 : vector<16x32xf32>
    %cst_156 = arith.constant 9.99999974E-6 : f32
    %370 = vector.broadcast %cst_156 : f32 to vector<16x1xf32>
    %371 = arith.addf %367, %370 : vector<16x1xf32>
    %372 = math.rsqrt %371 : vector<16x1xf32>
    %373 = vector.broadcast %372 : vector<16x1xf32> to vector<16x32xf32>
    %374 = arith.mulf %369, %373 : vector<16x32xf32>
    %375 = vector.broadcast %354 : vector<1x32xf32> to vector<16x32xf32>
    %376 = arith.mulf %374, %375 : vector<16x32xf32>
    %377 = vector.broadcast %356 : vector<1x32xf32> to vector<16x32xf32>
    %378 = arith.addf %376, %377 : vector<16x32xf32>
    %c0_157 = arith.constant 0 : index
    %c0_158 = arith.constant 0 : index
    %379 = vector.load %arg2[%c0_157, %c0_158] : memref<2x16xf32, #tpu.memory_space<vmem>>, vector<2x16xf32>
    %cst_159 = arith.constant dense<0.000000e+00> : vector<2x32xf32>
    %380 = tpu.matmul %379, %378, %cst_159 {dimension_numbers = #tpu.dot_dimension_numbers<[1], [0], [0], [1], [0, 0, 1, 1], [], []>} : vector<2x16xf32>, vector<16x32xf32>, vector<2x32xf32> -> vector<2x32xf32>
    %c0_160 = arith.constant 0 : index
    %c0_161 = arith.constant 0 : index
    %381 = vector.load %arg19[%c0_160, %c0_161] : memref<2x32xf32, #tpu.memory_space<vmem>>, vector<2x32xf32>
    tpu.vector_store %arg19[%c0_160, %c0_161], %380 {strides = array<i32>} : memref<2x32xf32, #tpu.memory_space<vmem>>, vector<2x32xf32>,
    return
  }
}

</mosaic_0001>

<bundles_post_ra>
// kernel: tpu_custom_call.1
= control target key start
LH: loop header
LB: loop body
LE: loop exit
PB: predicated region body
PF: predicated region fallthrough
CT: control target
= control target key end

     0   :  { %s4229_s0 = inlined_call_operand.vmem [shape: s32[16,1], index: 0, kind: input, shape index: {}]   ;;  %s4230_s1 = inlined_call_operand.vmem [shape: f32[16,16], index: 1, kind: input, shape index: {}]   ;;  %s4231_s2 = inlined_call_operand.vmem [shape: f32[2,16], index: 2, kind: input, shape index: {}]   ;;  %s4232_s3 = inlined_call_operand.vmem [shape: bf16[128,32], index: 3, kind: input, shape index: {}]   ;;  %s4233_s4 = inlined_call_operand.vmem [shape: f32[16,32], index: 4, kind: input, shape index: {}]   ;;  %s4234_s5 = inlined_call_operand.vmem [shape: f32[1,32], index: 5, kind: input, shape index: {}]   ;;  %s4235_s6 = inlined_call_operand.vmem [shape: f32[1,32], index: 6, kind: input, shape index: {}]   ;;  %s4236_s7 = inlined_call_operand.vmem [shape: bf16[2,32,96], index: 7, kind: input, shape index: {}]   ;;  %s4237_s8 = inlined_call_operand.vmem [shape: f32[2,1,32], index: 8, kind: input, shape index: {}]   ;;  %s4238_s9 = inlined_call_operand.vmem [shape: bf16[2,32,32], index: 9, kind: input, shape index: {}]   ;;  %s4239_s10 = inlined_call_operand.vmem [shape: f32[2,1,32], index: 10, kind: input, shape index: {}]   ;;  %s4240_s11 = inlined_call_operand.vmem [shape: f32[2,1,32], index: 11, kind: input, shape index: {}]   ;;  %s4241_s12 = inlined_call_operand.vmem [shape: f32[2,1,32], index: 12, kind: input, shape index: {}]   ;;  %s4242_s13 = inlined_call_operand.vmem [shape: bf16[2,32,64], index: 13, kind: input, shape index: {}]   ;;  %s4243_s14 = inlined_call_operand.vmem [shape: f32[2,1,64], index: 14, kind: input, shape index: {}]   ;;  %s4244_s15 = inlined_call_operand.vmem [shape: bf16[2,64,32], index: 15, kind: input, shape index: {}]   ;;  %s4245_s16 = inlined_call_operand.vmem [shape: f32[2,1,32], index: 16, kind: input, shape index: {}]   ;;  %s4246_s17 = inlined_call_operand.vmem [shape: f32[2,1,32], index: 17, kind: input, shape index: {}]   ;;  %s4247_s18 = inlined_call_operand.vmem [shape: f32[2,1,32], index: 18, kind: input, shape index: {}]   ;;  %s4248_s19 = inlined_call_operand.hbm [shape: f32[2,32], index: 19, kind: output, shape index: {}]  }
   0x1   :  { %4258 = sst [smem:[#allocation5_spill]] %s4229_s0 }
   0x2   :  { %4259 = sst [smem:[#allocation6_spill]] %s4230_s1 }
   0x3   :  { %4260 = sst [smem:[#allocation7_spill]] %s4231_s2 }
   0x4   :  { %4261 = sst [smem:[#allocation8_spill]] %s4232_s3 }
   0x5   :  { %s4262_s20 = sld [smem:[#allocation5_spill]]  ;;  %v3608_v1 = vmov 0   ;;  %v3609_v2 = vmov 0.0   ;;  %s4263_s22 = sld [smem:[#allocation8_spill]]  ;;  %vm3610_vm0 = vmmov 0  }
   0x6   :  { %3351 = vset.pattern.permute.xlu0 %v3608_v1  ;;  %3037 = vmatprep.subr.bf16.mxu0 %v3609_v2 }
   0x7   :  { %3057 = vmatprep.subr.bf16.mxu1 %v3609_v2  ;;  %3053 = vmatprep.mubr.msk.bf16.mxu0 %vm3610_vm0, %v3609_v2 }
   0x8   :  { %3061 = vmatprep.mubr.msk.bf16.mxu1 %vm3610_vm0, %v3609_v2 }
   0xb   :  { %v64_v0 = vld [vmem:[%s4262_s20] sm:$0xff]  ;;  %v65_v4 = vld [vmem:[%s4262_s20 + $0x8] sm:$0xff]  ;;  %v3464_v6 = vld [vmem:[%s4263_s22 + $0x10] sm:$0xff]  }
   0xc   :  { %v3462_v3 = vld [vmem:[%s4263_s22] sm:$0xff]   ;;  %69 = vperm.xlu0 %3351, %v64_v0   ;;  %v3463_v5 = vld [vmem:[%s4263_s22 + $0x8] sm:$0xff]   ;;  %v3465_v7 = vld [vmem:[%s4263_s22 + $0x18] sm:$0xff]  }
   0xd   :  { %3038 = vmatpush3.bf16.msra.mxu0 %v3462_v3  ;;  %v3466_v8 = vld [vmem:[%s4263_s22 + $0x20] sm:$0xff]   ;;  %v3467_v9 = vld [vmem:[%s4263_s22 + $0x28] sm:$0xff]  }
   0xe   :  { %3039 = vmatprep.subr.bf16.mxu0 %v3609_v2 }
  0x10   :  { %72 = vperm.xlu0 %3351, %v65_v4  }
  0x11   :  { %3040 = vmatpush3.bf16.msra.mxu0 %v3463_v5 }
  0x12   :  { %3041 = vmatprep.subr.bf16.mxu0 %v3609_v2 }
  0x15   :  { %3042 = vmatpush3.bf16.msra.mxu0 %v3464_v6 }
  0x16   :  { %3043 = vmatprep.subr.bf16.mxu0 %v3609_v2 }
  0x19   :  { %3044 = vmatpush3.bf16.msra.mxu0 %v3465_v7 }
  0x1a   :  { %3045 = vmatprep.subr.bf16.mxu0 %v3609_v2 }
  0x1d   :  { %3046 = vmatpush3.bf16.msra.mxu0 %v3466_v8 }
  0x1e   :  { %3047 = vmatprep.subr.bf16.mxu0 %v3609_v2 }
  0x1f   :  { %24 = vsyncpa [#allocation3], 0  ;;  %v3468_v10 = vld [vmem:[%s4263_s22 + $0x30] sm:$0xff]   ;;  %v3469_v11 = vld [vmem:[%s4263_s22 + $0x38] sm:$0xff]   ;;  %v66_v12 = vlaneseq  ;;  %v3611_v16 = vmov 1.0|1.0  }
  0x20   :  { %v95_v17 = vld [vmem:[%s4233_s4] sm:$0xff]  ;;  %v96_v19 = vld [vmem:[%s4233_s4 + $0x8] sm:$0xff]  ;;  %vm188_vm4 = vcmask 261120   ;;  %vm310_vm5 = vcmask 64512   ;;  %s4266_s23 = sld [smem:[#allocation6_spill]]  ;;  %vm396_vm7 = vcmask 130048  }
  0x21   :  { %3048 = vmatpush3.bf16.msra.mxu0 %v3467_v9  ;;  %v67_v14 = vand.u32 127, %v66_v12  ;;  %v3470_v37 = vld [vmem:[%s4236_s7] sm:$0xff]   ;;  %v3471_v38 = vld [vmem:[%s4236_s7 + $0x8] sm:$0xff]   ;;  %vm3816_vm6 = vmpackc.low %vm310_vm5, %vm310_vm5  ;;  %s3613_s3 = smov 88   ;;  %s3614_s26 = smov 64   ;;  %vm1134_vm8 = vcmask 195584  }
  0x22   :  { %3049 = vmatprep.subr.bf16.mxu0 %v3609_v2  ;;  %3058 = vmatpush3.bf16.msra.mxu1 %v3470_v37  ;;  %v2810_v47 = vld [vmem:[%s4234_s5] ss:$0 sm:$0xff]  ;;  %s3612_s5 = smov 96   ;;  %s3615_s4 = smov 120   ;;  %vm1377_vm9 = vcmask 523264   ;;  %vm2784_vm10 = vcmask 254976  }
  0x23   :  { %3059 = vmatprep.subr.bf16.mxu1 %v3609_v2  ;;  %v2811_v51 = vld [vmem:[%s4235_s6] ss:$0 sm:$0xff]  ;;  %s3616_s22 = smov 56   ;;  %s3617_s27 = smov 112  }
  0x24   :  { %v2815_v56 = vld [vmem:[%s4237_s8] ss:$0 sm:$0xff]  ;;  %s3618_s28 = smov 80   ;;  %s3619_s29 = smov 48  }
  0x25   :  { %3050 = vmatpush3.bf16.msra.mxu0 %v3468_v10  ;;  %s4256_s0 = smov 104   ;;  %s3621_s30 = smov 72  }
  0x26   :  { %3051 = vmatprep.subr.bf16.mxu0 %v3609_v2  ;;  %3060 = vmatpush3.bf16.msra.mxu1 %v3471_v38  ;;  %v3829_v6 = vld [vmem:[%s4266_s23 + $0x8] sm:$0xff]  ;;  %v3834_v7 = vld [vmem:[%s4266_s23] sm:$0xff]  ;;  %s4252_s20 = smov 40   ;;  %s4254_s21 = smov 16  }
  0x27   :  { %s4255_s1 = smov 8   ;;  %s4271_s6 = smov 24  }
  0x29   :  { %3052 = vmatpush3.bf16.msra.mxu0 %v3469_v11 }
  0x8b   :  { %v70_v13 = vpop.permute.xlu0 %69 }
  0x8c   :  { %vm74_vm1 = vcmp.eq.s32.totalorder %v70_v13, %v67_v14 }
  0x8f   :  { %v73_v15 = vpop.permute.xlu0 %72 }
  0x90   :  { %vm75_vm2 = vcmp.eq.s32.totalorder %v73_v15, %v67_v14 }
  0x91   :  { %vm2808_vm3 = vmpackc.low %vm75_vm2, %vm74_vm1 }
  0x92   :  { %3054 = vmatmul.mubr.msk.bf16.vlgmr.msra.gmra.mrb[0].mxu0 %vm2808_vm3, %v3611_v16 }
 0x165   :  { %v179_v18 = vpop.f32.mrb[0].mxu0 }
 0x166   :  { %v180_v20 = vadd.f32 %v179_v18, %v95_v17  ;;  %v3055_v21 = vpop.f32.mrb[1].mxu0 }
 0x167   :  { %v182_v22 = vpop.f32.mrb[2].mxu0 }
 0x168   :  { %v183_v23 = vadd.f32 %v182_v22, %v96_v19  ;;  %v3056_v24 = vpop.f32.mrb[3].mxu0  ;;  %v189_v25 = vsel %vm188_vm4, %v180_v20, 0.0 }
 0x169   :  { %190 = vadd.xlane.f32.xlu1 %v189_v25 }
 0x16a   :  { %v192_v26 = vsel %vm188_vm4, %v183_v23, 0.0 }
 0x16d   :  { %193 = vadd.xlane.f32.xlu1 %v192_v26 }
 0x1f6   :  { %v191_v27 = vpop.xlane.xlu1 %190 }
 0x1f7   :  { %v196_v28 = vmul.f32 0.03125, %v191_v27 }
 0x1f9   :  { %v198_v29 = vsub.f32 %v180_v20, %v196_v28 }
 0x1fa   :  { %v194_v30 = vpop.xlane.xlu1 %193 }
 0x1fb   :  { %v197_v31 = vmul.f32 0.03125, %v194_v30  ;;  %v200_v32 = vmul.f32 %v198_v29, %v198_v29 }
 0x1fd   :  { %v199_v33 = vsub.f32 %v183_v23, %v197_v31  ;;  %v202_v34 = vsel %vm188_vm4, %v200_v32, 0.0 }
 0x1fe   :  { %203 = vadd.xlane.f32.xlu0 %v202_v34 }
 0x1ff   :  { %v201_v35 = vmul.f32 %v199_v33, %v199_v33 }
 0x201   :  { %v205_v36 = vsel %vm188_vm4, %v201_v35, 0.0 }
 0x202   :  { %206 = vadd.xlane.f32.xlu1 %v205_v36 }
 0x28b   :  { %v204_v39 = vpop.xlane.xlu0 %203 }
 0x28c   :  { %v208_v40 = vmul.f32 0.03125, %v204_v39 }
 0x28e   :  { %v210_v41 = vadd.f32 1e-05, %v208_v40 }
 0x28f   :  { %v207_v42 = vpop.xlane.xlu1 %206 }
 0x290   :  { %3490 = vrsqrt.f32 %v210_v41  ;;  %v209_v43 = vmul.f32 0.03125, %v207_v42 }
 0x292   :  { %v211_v44 = vadd.f32 1e-05, %v209_v43 }
 0x294   :  { %3492 = vrsqrt.f32 %v211_v44 }
 0x29a   :  { %v3491_v45 = vpop.eup %3490 }
 0x29b   :  { %v214_v46 = vmul.f32 %v3491_v45, %v198_v29 }
 0x29d   :  { %v222_v50 = vmul.f32 %v2810_v47, %v214_v46 }
 0x29e   :  { %v3493_v48 = vpop.eup %3492 }
 0x29f   :  { %v215_v49 = vmul.f32 %v3493_v48, %v199_v33  ;;  %v3794_v53 = vadd.f32 %v2811_v51, %v222_v50 }
 0x2a1   :  { %v223_v52 = vmul.f32 %v2810_v47, %v215_v49 }
 0x2a3   :  { %v3796_v54 = vadd.f32 %v2811_v51, %v223_v52 }
 0x2a5   :  { %v234_v55 = vpack.c.bf16 %v3796_v54, %v3794_v53 }
 0x2a7   :  { %3062 = vmatmul.mubr.msk.bf16.vlgmr.msra.gmra.mrb[0].mxu1 %vm188_vm4, %v234_v55 }
 0x37a   :  { %v288_v57 = vpop.f32.mrb[0].mxu1 }
 0x37b   :  { %v3063_v58 = vpop.f32.mrb[1].mxu1  ;;  %v3804_v59 = vadd.f32 %v2815_v56, %v288_v57 }
 0x37c   :  { %v291_v60 = vpop.f32.mrb[2].mxu1 }
 0x37d   :  { %v3064_v61 = vpop.f32.mrb[3].mxu1  ;;  %v3806_v62 = vadd.f32 %v2815_v56, %v291_v60  ;;  %3069 = vmatprep.mubr.msk.f32.mxu1 %vm310_vm5, %v3804_v59  ;;  %v3810_v63 = vpack.i.bf16 %v291_v60, %v288_v57 }
 0x37f   :  { %3353 = vrot.lane.b32.xlu1 %v3810_v63, %s3612_s5 }
 0x3f1   :  { %v3354_v0 = vpop.permute.xlu1 %3353 }
 0x3f2   :  { %v3356_v1 = vunpack.i.h.bf16 %v3354_v0  ;;  %v3355_v3 = vunpack.i.l.bf16 %v3354_v0 }
 0x3f4   :  { %v3248_v5 = vpack.c.bf16 %v3356_v1, %v3355_v3 }
 0x3f6   :  { %3250 = vmatprep.subr.msk.bf16.mxu1 %vm3816_vm6, %v3248_v5 }
 0x3f7   :  { %3253 = vmatpush3.bf16.xpose.msk.msra.mxu1 %vm3816_vm6, %v3248_v5 }
 0x3fe   :  { %3070 = vmatmul.mubr.msk.f32.vlgmr.msra.gmra.mrb[4].mxu1 %vm310_vm5, %v3806_v62 }
 0x4d1   :  { %v3071_v8 = vpop.f32.mrb[4].mxu1 }
 0x4d2   :  { %v393_v9 = vadd.f32 %v3071_v8, %v3829_v6  ;;  %v387_v10 = vpop.f32.mrb[5].mxu1 }
 0x4d3   :  { %v388_v11 = vadd.f32 %v387_v10, %v3834_v7 }
 0x4d4   :  { %v400_v12 = vsel %vm396_vm7, %v393_v9, -inf }
 0x4d5   :  { %401 = vmax.xlane.f32.xlu0 %v400_v12  ;;  %v397_v13 = vsel %vm396_vm7, %v388_v11, -inf }
 0x4d6   :  { %398 = vmax.xlane.f32.xlu1 %v397_v13 }
 0x4e7   :  { %3363 = vrot.lane.b32.xlu1 %v3810_v63, %s3613_s3 }
 0x4eb   :  { %3358 = vrot.lane.b32.xlu0 %v3810_v63, %s3614_s26 }
 0x562   :  { %v402_v14 = vpop.xlane.xlu0 %401 }
 0x563   :  { %v404_v15 = vsub.f32 %v393_v9, %v402_v14  ;;  %v399_v16 = vpop.xlane.xlu1 %398 }
 0x564   :  { %v403_v17 = vsub.f32 %v388_v11, %v399_v16 }
 0x565   :  { %v407_v18 = vmul.f32 1.442695, %v404_v15 }
 0x566   :  { %v405_v19 = vmul.f32 1.442695, %v403_v17  ;;  %v3359_v20 = vpop.permute.xlu0 %3358 }
 0x567   :  { %3494 = vpow2.f32 %v407_v18  ;;  %v3361_v21 = vunpack.i.h.bf16 %v3359_v20  ;;  %v3360_v22 = vunpack.i.l.bf16 %v3359_v20  ;;  %v3364_v23 = vpop.permute.xlu1 %3363 }
 0x568   :  { %v3366_v24 = vunpack.i.h.bf16 %v3364_v23  ;;  %v3365_v25 = vunpack.i.l.bf16 %v3364_v23  ;;  %3496 = vpow2.f32 %v405_v19 }
 0x569   :  { %v3254_v26 = vpack.c.bf16 %v3361_v21, %v3360_v22 }
 0x56a   :  { %v3258_v27 = vpack.c.bf16 %v3366_v24, %v3365_v25 }
 0x56b   :  { %3255 = vmatprep.subr.bf16.mxu1 %v3254_v26 }
 0x56c   :  { %3257 = vmatpush3.bf16.msra.mxu1 %v3254_v26 }
 0x56d   :  { %3260 = vmatprep.subr.msk.bf16.mxu1 %vm3816_vm6, %v3258_v27 }
 0x571   :  { %v3495_v28 = vpop.eup %3494 }
 0x572   :  { %v412_v29 = vsel %vm396_vm7, %v3495_v28, 0.0  ;;  %v3497_v30 = vpop.eup %3496 }
 0x573   :  { %413 = vadd.xlane.f32.xlu0 %v412_v29  ;;  %v409_v31 = vsel %vm396_vm7, %v3497_v30, 0.0 }
 0x577   :  { %410 = vadd.xlane.f32.xlu0 %v409_v31 }
 0x58d   :  { %506 = vrot.lane.b32.xlu0 %v3804_v59, %s3615_s4 }
 0x591   :  { %508 = vrot.lane.b32.xlu0 %v3806_v62, %s3615_s4 }
 0x600   :  { %v414_v32 = vpop.xlane.xlu0 %413 }
 0x601   :  { %3498 = vrcp.f32 %v414_v32 }
 0x604   :  { %v411_v33 = vpop.xlane.xlu0 %410 }
 0x605   :  { %3500 = vrcp.f32 %v411_v33 }
 0x608   :  { %v507_v38 = vpop.permute.xlu0 %506 }
 0x60b   :  { %v3499_v34 = vpop.eup %3498 }
 0x60c   :  { %v418_v37 = vmul.f32 %v3499_v34, %v3495_v28  ;;  %v509_v39 = vpop.permute.xlu0 %508 }
 0x60f   :  { %v3501_v35 = vpop.eup %3500 }
 0x610   :  { %v417_v36 = vmul.f32 %v3501_v35, %v3497_v30 }
 0x612   :  { %3076 = vmatprep.mubr.msk.f32.mxu1 %vm396_vm7, %v417_v36 }
 0x613   :  { %3077 = vmatmul.mubr.msk.f32.vlgmr.msra.gmra.mrb[6].mxu1 %vm396_vm7, %v418_v37 }
 0x614   :  { %3263 = vmatpush3.bf16.xpose.msk.msra.mxu1 %vm3816_vm6, %v3258_v27  ;;  %3083 = vmatprep.mubr.msk.f32.mxu1 %vm310_vm5, %v507_v38 }
 0x61b   :  { %3084 = vmatmul.mubr.msk.f32.vlgmr.msra.gmra.mrb[8].mxu1 %vm310_vm5, %v509_v39 }
 0x6e6   :  { %v3858_v40 = vpop.f32.mrb[6].mxu1 }
 0x6e7   :  { %v3860_v41 = vpop.f32.mrb[7].mxu1 }
 0x6ee   :  { %v3085_v42 = vpop.f32.mrb[8].mxu1 }
 0x6ef   :  { %v594_v43 = vadd.f32 %v3085_v42, %v3829_v6  ;;  %v588_v44 = vpop.f32.mrb[9].mxu1 }
 0x6f0   :  { %v589_v45 = vadd.f32 %v588_v44, %v3834_v7 }
 0x6f1   :  { %v600_v46 = vsel %vm396_vm7, %v594_v43, -inf }
 0x6f2   :  { %601 = vmax.xlane.f32.xlu1 %v600_v46  ;;  %v597_v47 = vsel %vm396_vm7, %v589_v45, -inf }
 0x6f3   :  { %598 = vmax.xlane.f32.xlu0 %v597_v47 }
 0x703   :  { %3368 = vrot.lane.b32.xlu1 %v3810_v63, %s3616_s22 }
 0x707   :  { %706 = vrot.lane.b32.xlu1 %v3804_v59, %s3617_s27 }
 0x70b   :  { %708 = vrot.lane.b32.xlu1 %v3806_v62, %s3617_s27 }
 0x77f   :  { %v602_v48 = vpop.xlane.xlu1 %601 }
 0x780   :  { %v604_v49 = vsub.f32 %v594_v43, %v602_v48  ;;  %v599_v50 = vpop.xlane.xlu0 %598 }
 0x781   :  { %v603_v51 = vsub.f32 %v589_v45, %v599_v50 }
 0x782   :  { %v607_v52 = vmul.f32 1.442695, %v604_v49 }
 0x783   :  { %v605_v55 = vmul.f32 1.442695, %v603_v51  ;;  %v3369_v56 = vpop.permute.xlu1 %3368 }
 0x784   :  { %3502 = vpow2.f32 %v607_v52  ;;  %v3371_v57 = vunpack.i.h.bf16 %v3369_v56  ;;  %v3370_v58 = vunpack.i.l.bf16 %v3369_v56 }
 0x785   :  { %3504 = vpow2.f32 %v605_v55 }
 0x786   :  { %v3264_v60 = vpack.c.bf16 %v3371_v57, %v3370_v58 }
 0x787   :  { %v707_v17 = vpop.permute.xlu1 %706 }
 0x788   :  { %3265 = vmatprep.subr.bf16.mxu1 %v3264_v60 }
 0x789   :  { %3267 = vmatpush3.bf16.msra.mxu1 %v3264_v60 }
 0x78b   :  { %v709_v18 = vpop.permute.xlu1 %708 }
 0x78e   :  { %v3503_v61 = vpop.eup %3502 }
 0x78f   :  { %v612_v0 = vsel %vm396_vm7, %v3503_v61, 0.0  ;;  %v3505_v1 = vpop.eup %3504 }
 0x790   :  { %613 = vadd.xlane.f32.xlu0 %v612_v0  ;;  %v609_v3 = vsel %vm396_vm7, %v3505_v1, 0.0 }
 0x794   :  { %610 = vadd.xlane.f32.xlu0 %v609_v3 }
 0x7aa   :  { %3373 = vrot.lane.b32.xlu0 %v3810_v63, %s3618_s28 }
 0x81d   :  { %v614_v5 = vpop.xlane.xlu0 %613 }
 0x81e   :  { %3506 = vrcp.f32 %v614_v5 }
 0x821   :  { %v611_v8 = vpop.xlane.xlu0 %610 }
 0x822   :  { %3508 = vrcp.f32 %v611_v8 }
 0x825   :  { %v3374_v9 = vpop.permute.xlu0 %3373 }
 0x826   :  { %v3376_v10 = vunpack.i.h.bf16 %v3374_v9  ;;  %v3375_v11 = vunpack.i.l.bf16 %v3374_v9 }
 0x828   :  { %v3268_v12 = vpack.c.bf16 %v3376_v10, %v3375_v11  ;;  %v3507_v13 = vpop.eup %3506 }
 0x829   :  { %v618_v16 = vmul.f32 %v3507_v13, %v3503_v61 }
 0x82a   :  { %3270 = vmatprep.subr.msk.bf16.mxu1 %vm3816_vm6, %v3268_v12 }
 0x82c   :  { %v3509_v14 = vpop.eup %3508 }
 0x82d   :  { %v617_v15 = vmul.f32 %v3509_v14, %v3505_v1 }
 0x82f   :  { %3090 = vmatprep.mubr.msk.f32.mxu1 %vm396_vm7, %v617_v15 }
 0x830   :  { %3091 = vmatmul.mubr.msk.f32.vlgmr.msra.gmra.mrb[10].mxu1 %vm396_vm7, %v618_v16 }
 0x831   :  { %3273 = vmatpush3.bf16.xpose.msk.msra.mxu1 %vm3816_vm6, %v3268_v12  ;;  %3097 = vmatprep.mubr.msk.f32.mxu1 %vm310_vm5, %v707_v17 }
 0x838   :  { %3098 = vmatmul.mubr.msk.f32.vlgmr.msra.gmra.mrb[12].mxu1 %vm310_vm5, %v709_v18 }
 0x903   :  { %v3884_v19 = vpop.f32.mrb[10].mxu1 }
 0x904   :  { %v3886_v20 = vpop.f32.mrb[11].mxu1 }
 0x905   :  { %v3392_v21 = vpack.i.bf16 %v3884_v19, %v3886_v20  ;;  %v3472_v19 = vld [vmem:[%s4238_s9] sm:$0xff]   ;;  %v3473_v20 = vld [vmem:[%s4238_s9 + $0x8] sm:$0xff]  }
 0x90b   :  { %v3099_v22 = vpop.f32.mrb[12].mxu1 }
 0x90c   :  { %v794_v23 = vadd.f32 %v3099_v22, %v3829_v6  ;;  %v788_v24 = vpop.f32.mrb[13].mxu1 }
 0x90d   :  { %v789_v25 = vadd.f32 %v788_v24, %v3834_v7 }
 0x90e   :  { %v800_v26 = vsel %vm396_vm7, %v794_v23, -inf }
 0x90f   :  { %801 = vmax.xlane.f32.xlu1 %v800_v26  ;;  %v797_v27 = vsel %vm396_vm7, %v789_v25, -inf }
 0x910   :  { %798 = vmax.xlane.f32.xlu0 %v797_v27 }
 0x920   :  { %3378 = vrot.lane.b32.xlu1 %v3810_v63, %s3619_s29 }
 0x924   :  { %906 = vrot.lane.b32.xlu1 %v3804_v59, %s4256_s0 }
 0x928   :  { %908 = vrot.lane.b32.xlu1 %v3806_v62, %s4256_s0 }
 0x99c   :  { %v802_v28 = vpop.xlane.xlu1 %801 }
 0x99d   :  { %v804_v29 = vsub.f32 %v794_v23, %v802_v28  ;;  %v799_v30 = vpop.xlane.xlu0 %798 }
 0x99e   :  { %v803_v31 = vsub.f32 %v789_v25, %v799_v30 }
 0x99f   :  { %v807_v32 = vmul.f32 1.442695, %v804_v29 }
 0x9a0   :  { %v805_v33 = vmul.f32 1.442695, %v803_v31  ;;  %v3379_v34 = vpop.permute.xlu1 %3378 }
 0x9a1   :  { %3510 = vpow2.f32 %v807_v32  ;;  %v3381_v35 = vunpack.i.h.bf16 %v3379_v34  ;;  %v3380_v36 = vunpack.i.l.bf16 %v3379_v34 }
 0x9a2   :  { %3512 = vpow2.f32 %v805_v33 }
 0x9a3   :  { %v3274_v37 = vpack.c.bf16 %v3381_v35, %v3380_v36 }
 0x9a4   :  { %v907_v52 = vpop.permute.xlu1 %906 }
 0x9a5   :  { %3275 = vmatprep.subr.bf16.mxu1 %v3274_v37 }
 0x9a6   :  { %3277 = vmatpush3.bf16.msra.mxu1 %v3274_v37 }
 0x9a8   :  { %v909_v55 = vpop.permute.xlu1 %908 }
 0x9ab   :  { %v3511_v38 = vpop.eup %3510 }
 0x9ac   :  { %v812_v59 = vsel %vm396_vm7, %v3511_v38, 0.0  ;;  %v3513_v39 = vpop.eup %3512 }
 0x9ad   :  { %813 = vadd.xlane.f32.xlu0 %v812_v59  ;;  %v809_v62 = vsel %vm396_vm7, %v3513_v39, 0.0 }
 0x9b1   :  { %810 = vadd.xlane.f32.xlu0 %v809_v62 }
 0x9c7   :  { %3383 = vrot.lane.b32.xlu0 %v3810_v63, %s3621_s30 }
 0xa3a   :  { %v814_v42 = vpop.xlane.xlu0 %813 }
 0xa3b   :  { %3514 = vrcp.f32 %v814_v42 }
 0xa3e   :  { %v811_v43 = vpop.xlane.xlu0 %810 }
 0xa3f   :  { %3516 = vrcp.f32 %v811_v43 }
 0xa42   :  { %v3384_v44 = vpop.permute.xlu0 %3383 }
 0xa43   :  { %v3386_v45 = vunpack.i.h.bf16 %v3384_v44  ;;  %v3385_v46 = vunpack.i.l.bf16 %v3384_v44 }
 0xa45   :  { %v3278_v47 = vpack.c.bf16 %v3386_v45, %v3385_v46  ;;  %v3515_v48 = vpop.eup %3514 }
 0xa46   :  { %v818_v51 = vmul.f32 %v3515_v48, %v3511_v38 }
 0xa47   :  { %3280 = vmatprep.subr.msk.bf16.mxu1 %vm3816_vm6, %v3278_v47 }
 0xa49   :  { %v3517_v49 = vpop.eup %3516 }
 0xa4a   :  { %v817_v50 = vmul.f32 %v3517_v49, %v3513_v39 }
 0xa4c   :  { %3104 = vmatprep.mubr.msk.f32.mxu1 %vm396_vm7, %v817_v50 }
 0xa4d   :  { %3105 = vmatmul.mubr.msk.f32.vlgmr.msra.gmra.mrb[14].mxu1 %vm396_vm7, %v818_v51 }
 0xa4e   :  { %3283 = vmatpush3.bf16.xpose.msk.msra.mxu1 %vm3816_vm6, %v3278_v47  ;;  %3111 = vmatprep.mubr.msk.f32.mxu1 %vm310_vm5, %v907_v52 }
 0xa4f   :  { %3129 = vmatprep.subr.bf16.mxu1 %v3609_v2 }
 0xa55   :  { %3112 = vmatmul.mubr.msk.f32.vlgmr.msra.gmra.mrb[16].mxu1 %vm310_vm5, %v909_v55 }
 0xa56   :  { %3133 = vmatprep.mubr.msk.bf16.mxu1 %vm3610_vm0, %v3609_v2 }
 0xb20   :  { %v3106_v56 = vpop.f32.mrb[14].mxu1 }
 0xb21   :  { %v897_v57 = vpop.f32.mrb[15].mxu1 }
 0xb22   :  { %v3397_v58 = vpack.i.bf16 %v3106_v56, %v897_v57 }
 0xb28   :  { %v3113_v60 = vpop.f32.mrb[16].mxu1 }
 0xb29   :  { %v994_v61 = vadd.f32 %v3113_v60, %v3829_v6  ;;  %v988_v0 = vpop.f32.mrb[17].mxu1 }
 0xb2a   :  { %v989_v1 = vadd.f32 %v988_v0, %v3834_v7 }
 0xb2b   :  { %v1000_v3 = vsel %vm396_vm7, %v994_v61, -inf }
 0xb2c   :  { %1001 = vmax.xlane.f32.xlu1 %v1000_v3  ;;  %v997_v5 = vsel %vm396_vm7, %v989_v1, -inf }
 0xb2d   :  { %998 = vmax.xlane.f32.xlu0 %v997_v5 }
 0xb3d   :  { %3388 = vrot.lane.b32.xlu1 %v3810_v63, %s4252_s20  ;;  %s4253_s20 = smov 24  }
 0xb41   :  { %3398 = vrot.lane.b32.xlu1 %v3397_v58, %s4254_s21 }
 0xbb9   :  { %v1002_v8 = vpop.xlane.xlu1 %1001 }
 0xbba   :  { %v1004_v9 = vsub.f32 %v994_v61, %v1002_v8  ;;  %v999_v10 = vpop.xlane.xlu0 %998 }
 0xbbb   :  { %v1003_v11 = vsub.f32 %v989_v1, %v999_v10 }
 0xbbc   :  { %v1007_v12 = vmul.f32 1.442695, %v1004_v9 }
 0xbbd   :  { %v1005_v13 = vmul.f32 1.442695, %v1003_v11  ;;  %v3389_v14 = vpop.permute.xlu1 %3388  ;;  %v3475_v11 = vld [vmem:[%s4242_s13 + $0x8] sm:$0xff]  }
 0xbbe   :  { %v3391_v15 = vunpack.i.h.bf16 %v3389_v14  ;;  %v3390_v16 = vunpack.i.l.bf16 %v3389_v14 }
 0xbbf   :  { %3518 = vpow2.f32 %v1005_v13 }
 0xbc0   :  { %v3284_v17 = vpack.c.bf16 %v3391_v15, %v3390_v16  ;;  %3520 = vpow2.f32 %v1007_v12 }
 0xbc1   :  { %v3399_v35 = vpop.permute.xlu1 %3398 }
 0xbc2   :  { %3285 = vmatprep.subr.bf16.mxu0 %v3284_v17  ;;  %v3401_v38 = vunpack.i.h.bf16 %v3399_v35  ;;  %v3400_v59 = vunpack.i.l.bf16 %v3399_v35 }
 0xbc3   :  { %3287 = vmatpush3.bf16.msra.mxu0 %v3284_v17 }
 0xbc4   :  { %3121 = vmatprep.subr.bf16.mxu0 %v3609_v2 }
 0xbc9   :  { %v3519_v63 = vpop.eup %3518 }
 0xbca   :  { %v1009_v18 = vsel %vm396_vm7, %v3519_v63, 0.0  ;;  %v3521_v22 = vpop.eup %3520 }
 0xbcb   :  { %1010 = vadd.xlane.f32.xlu0 %v1009_v18  ;;  %v1012_v23 = vsel %vm396_vm7, %v3521_v22, 0.0 }
 0xbcf   :  { %1013 = vadd.xlane.f32.xlu0 %v1012_v23 }
 0xbe5   :  { %3393 = vrot.lane.b32.xlu0 %v3392_v21, %s4255_s1 }
 0xc58   :  { %v1011_v24 = vpop.xlane.xlu0 %1010 }
 0xc59   :  { %3522 = vrcp.f32 %v1011_v24 }
 0xc5c   :  { %v1014_v25 = vpop.xlane.xlu0 %1013 }
 0xc5d   :  { %3524 = vrcp.f32 %v1014_v25 }
 0xc60   :  { %v3394_v32 = vpop.permute.xlu0 %3393 }
 0xc61   :  { %v3396_v33 = vunpack.i.h.bf16 %v3394_v32  ;;  %v3395_v34 = vunpack.i.l.bf16 %v3394_v32  ;;  %v2846_v32 = vld [vmem:[%s4243_s14] ss:$0 sm:$0xff] }
 0xc63   :  { %v3523_v26 = vpop.eup %3522  ;;  %v1131_v36 = vsel %vm310_vm5, %v3858_v40, %v3396_v33  ;;  %v1130_v37 = vsel %vm310_vm5, %v3860_v41, %v3395_v34  ;;  %v2840_v40 = vld [vmem:[%s4239_s10] ss:$0 sm:$0xff] }
 0xc64   :  { %v1017_v27 = vmul.f32 %v3523_v26, %v3519_v63  ;;  %v1132_v43 = vsel %vm396_vm7, %v1130_v37, %v3400_v59  ;;  %v1133_v44 = vsel %vm396_vm7, %v1131_v36, %v3401_v38  ;;  %v2845_v26 = vld [vmem:[%s4241_s12] ss:$0 sm:$0xff] }
 0xc66   :  { %3118 = vmatprep.mubr.msk.f32.mxu0 %vm396_vm7, %v1017_v27 }
 0xc67   :  { %v3525_v28 = vpop.eup %3524 }
 0xc68   :  { %v1018_v29 = vmul.f32 %v3525_v28, %v3521_v22  ;;  %v2844_v22 = vld [vmem:[%s4240_s11] ss:$0 sm:$0xff] }
 0xc6a   :  { %3119 = vmatmul.mubr.msk.f32.vlgmr.msra.gmra.mrb[4].mxu0 %vm396_vm7, %v1018_v29 }
 0xc6b   :  { %3125 = vmatprep.mubr.msk.bf16.mxu0 %vm3610_vm0, %v3609_v2  ;;  %3122 = vmatpush3.bf16.msra.mxu0 %v3472_v19 }
 0xc6c   :  { %3123 = vmatprep.subr.bf16.mxu0 %v3609_v2 }
 0xc6f   :  { %3124 = vmatpush3.bf16.msra.mxu0 %v3473_v20  ;;  %v3476_v20 = vld [vmem:[%s4244_s15] sm:$0xff]  }
 0xc70   :  { %3137 = vmatprep.subr.bf16.mxu0 %v3609_v2 }
 0xd3d   :  { %v3120_v21 = vpop.f32.mrb[4].mxu0 }
 0xd3e   :  { %v1097_v30 = vpop.f32.mrb[5].mxu0 }
 0xd3f   :  { %v3402_v31 = vpack.i.bf16 %v3120_v21, %v1097_v30  ;;  %v3477_v21 = vld [vmem:[%s4244_s15 + $0x8] sm:$0xff]   ;;  %v3478_v30 = vld [vmem:[%s4244_s15 + $0x10] sm:$0xff]  }
 0xd41   :  { %3403 = vrot.lane.b32.xlu1 %v3402_v31, %s4253_s20  ;;  %v3479_v31 = vld [vmem:[%s4244_s15 + $0x18] sm:$0xff]  }
 0xdb3   :  { %v3404_v39 = vpop.permute.xlu1 %3403 }
 0xdb4   :  { %v3406_v62 = vunpack.i.h.bf16 %v3404_v39  ;;  %v3405_v42 = vunpack.i.l.bf16 %v3404_v39 }
 0xdb6   :  { %v1136_v45 = vsel %vm1134_vm8, %v1133_v44, %v3406_v62  ;;  %v1135_v46 = vsel %vm1134_vm8, %v1132_v43, %v3405_v42 }
 0xdb7   :  { %v1137_v47 = vpack.c.bf16 %v1136_v45, %v1135_v46 }
 0xdb9   :  { %3126 = vmatmul.mubr.msk.bf16.vlgmr.msra.gmra.mrb[8].mxu0 %vm188_vm4, %v1137_v47 }
 0xdba   :  { %3145 = vmatprep.mubr.msk.bf16.mxu0 %vm3610_vm0, %v3609_v2  ;;  %3138 = vmatpush3.bf16.msra.mxu0 %v3476_v20  ;;  %v2856_v20 = vld [vmem:[%s4246_s17] ss:$0 sm:$0xff] }
 0xdbb   :  { %3139 = vmatprep.subr.bf16.mxu0 %v3609_v2 }
 0xdbe   :  { %3140 = vmatpush3.bf16.msra.mxu0 %v3477_v21 }
 0xdbf   :  { %3141 = vmatprep.subr.bf16.mxu0 %v3609_v2 }
 0xdc2   :  { %3142 = vmatpush3.bf16.msra.mxu0 %v3478_v30 }
 0xdc3   :  { %3143 = vmatprep.subr.bf16.mxu0 %v3609_v2 }
 0xdc6   :  { %3144 = vmatpush3.bf16.msra.mxu0 %v3479_v31 }
 0xe8c   :  { %v1198_v41 = vpop.f32.mrb[8].mxu0 }
 0xe8d   :  { %v1199_v48 = vadd.f32 %v2840_v40, %v1198_v41  ;;  %v3127_v49 = vpop.f32.mrb[9].mxu0 }
 0xe8e   :  { %v1201_v50 = vpop.f32.mrb[10].mxu0 }
 0xe8f   :  { %v1202_v51 = vadd.f32 %v2840_v40, %v1201_v50  ;;  %v3128_v52 = vpop.f32.mrb[11].mxu0  ;;  %v1205_v55 = vadd.f32 %v1199_v48, %v3794_v53 }
 0xe91   :  { %v1209_v56 = vsel %vm188_vm4, %v1205_v55, 0.0  ;;  %v1206_v57 = vadd.f32 %v1202_v51, %v3796_v54  ;;  %v3474_v54 = vld [vmem:[%s4242_s13] sm:$0xff]  }
 0xe92   :  { %1210 = vadd.xlane.f32.xlu0 %v1209_v56  ;;  %3130 = vmatpush3.bf16.msra.mxu1 %v3474_v54 }
 0xe93   :  { %v1212_v58 = vsel %vm188_vm4, %v1206_v57, 0.0  ;;  %3131 = vmatprep.subr.bf16.mxu1 %v3609_v2 }
 0xe94   :  { %1213 = vadd.xlane.f32.xlu1 %v1212_v58  ;;  %v2850_v58 = vld [vmem:[%s4245_s16] ss:$0 sm:$0xff] }
 0xe96   :  { %3132 = vmatpush3.bf16.msra.mxu1 %v3475_v11 }
 0xe97   :  { %3149 = vmatprep.subr.bf16.mxu1 %v3609_v2 }
 0xf1f   :  { %v1211_v60 = vpop.xlane.xlu0 %1210 }
 0xf20   :  { %v1215_v61 = vmul.f32 0.03125, %v1211_v60 }
 0xf21   :  { %v1214_v0 = vpop.xlane.xlu1 %1213 }
 0xf22   :  { %v1217_v1 = vsub.f32 %v1205_v55, %v1215_v61  ;;  %v1216_v3 = vmul.f32 0.03125, %v1214_v0 }
 0xf24   :  { %v1218_v5 = vsub.f32 %v1206_v57, %v1216_v3  ;;  %v1219_v8 = vmul.f32 %v1217_v1, %v1217_v1 }
 0xf26   :  { %v1221_v9 = vsel %vm188_vm4, %v1219_v8, 0.0  ;;  %v1220_v10 = vmul.f32 %v1218_v5, %v1218_v5 }
 0xf27   :  { %1222 = vadd.xlane.f32.xlu0 %v1221_v9 }
 0xf28   :  { %v1224_v53 = vsel %vm188_vm4, %v1220_v10, 0.0 }
 0xf2b   :  { %1225 = vadd.xlane.f32.xlu0 %v1224_v53 }
 0xfb4   :  { %v1223_v12 = vpop.xlane.xlu0 %1222 }
 0xfb5   :  { %v1227_v13 = vmul.f32 0.03125, %v1223_v12 }
 0xfb7   :  { %v1229_v14 = vadd.f32 1e-05, %v1227_v13 }
 0xfb8   :  { %v1226_v15 = vpop.xlane.xlu0 %1225 }
 0xfb9   :  { %3526 = vrsqrt.f32 %v1229_v14  ;;  %v1228_v16 = vmul.f32 0.03125, %v1226_v15 }
 0xfbb   :  { %v1230_v17 = vadd.f32 1e-05, %v1228_v16 }
 0xfbd   :  { %3528 = vrsqrt.f32 %v1230_v17 }
 0xfc3   :  { %v3527_v63 = vpop.eup %3526 }
 0xfc4   :  { %v1233_v18 = vmul.f32 %v3527_v63, %v1217_v1 }
 0xfc6   :  { %v1241_v24 = vmul.f32 %v2844_v22, %v1233_v18 }
 0xfc7   :  { %v3529_v23 = vpop.eup %3528 }
 0xfc8   :  { %v1234_v25 = vmul.f32 %v3529_v23, %v1218_v5  ;;  %v1249_v28 = vadd.f32 %v2845_v26, %v1241_v24  ;;  %v3481_v23 = vld [vmem:[%s4236_s7 + $0x18] sm:$0xff]  }
 0xfca   :  { %v1242_v27 = vmul.f32 %v2844_v22, %v1234_v25  ;;  %v3480_v22 = vld [vmem:[%s4236_s7 + $0x10] sm:$0xff]  }
 0xfcc   :  { %v1250_v29 = vadd.f32 %v2845_v26, %v1242_v27 }
 0xfce   :  { %v1251_v19 = vpack.c.bf16 %v1250_v29, %v1249_v28 }
 0xfd0   :  { %3134 = vmatmul.mubr.msk.bf16.vlgmr.msra.gmra.mrb[20].mxu1 %vm188_vm4, %v1251_v19 }
 0xfd1   :  { %3153 = vmatprep.mubr.msk.bf16.mxu1 %vm3610_vm0, %v3609_v2  ;;  %3150 = vmatpush3.bf16.msra.mxu1 %v3480_v22 }
 0xfd2   :  { %3151 = vmatprep.subr.bf16.mxu1 %v3609_v2 }
 0xfd5   :  { %3152 = vmatpush3.bf16.msra.mxu1 %v3481_v23 }
0x10a3   :  { %v1312_v33 = vpop.f32.mrb[20].mxu1 }
0x10a4   :  { %v1313_v34 = vadd.f32 %v2846_v32, %v1312_v33  ;;  %v3135_v35 = vpop.f32.mrb[21].mxu1  ;;  %v2857_v33 = vld [vmem:[%s4247_s18] ss:$0 sm:$0xff] }
0x10a5   :  { %v1315_v36 = vpop.f32.mrb[22].mxu1 }
0x10a6   :  { %v1321_v37 = vmul.f32 0.044715, %v1313_v34  ;;  %v1316_v38 = vadd.f32 %v2846_v32, %v1315_v36  ;;  %v3136_v59 = vpop.f32.mrb[23].mxu1  ;;  %v1319_v50 = vmul.f32 0.5, %v1313_v34 }
0x10a8   :  { %v1323_v39 = vmul.f32 %v1321_v37, %v1313_v34  ;;  %v1322_v62 = vmul.f32 0.044715, %v1316_v38  ;;  %v1320_v51 = vmul.f32 0.5, %v1316_v38 }
0x10aa   :  { %v1325_v42 = vmul.f32 %v1323_v39, %v1313_v34  ;;  %v1324_v43 = vmul.f32 %v1322_v62, %v1316_v38 }
0x10ac   :  { %v1327_v44 = vadd.f32 %v1325_v42, %v1313_v34  ;;  %v1326_v45 = vmul.f32 %v1324_v43, %v1316_v38 }
0x10ae   :  { %v1329_v46 = vmul.f32 0.7978846, %v1327_v44  ;;  %v1328_v47 = vadd.f32 %v1326_v45, %v1316_v38  ;;  %v2866_v38 = vld [vmem:[%s4237_s8 + $0x1] ss:$0 sm:$0xff]  ;;  %s4267_s8 = smov 104  }
0x10b0   :  { %3530 = vtanh.f32 %v1329_v46  ;;  %v1330_v40 = vmul.f32 0.7978846, %v1328_v47 }
0x10b2   :  { %3532 = vtanh.f32 %v1330_v40 }
0x10ba   :  { %v3531_v41 = vpop.eup %3530 }
0x10bb   :  { %v1333_v48 = vadd.f32 1.0, %v3531_v41 }
0x10bc   :  { %v3533_v49 = vpop.eup %3532 }
0x10bd   :  { %v1334_v52 = vadd.f32 1.0, %v3533_v49  ;;  %v1335_v55 = vmul.f32 %v1333_v48, %v1319_v50 }
0x10bf   :  { %v1336_v56 = vmul.f32 %v1334_v52, %v1320_v51 }
0x10c1   :  { %v1337_v57 = vpack.c.bf16 %v1336_v56, %v1335_v55 }
0x10c3   :  { %3146 = vmatmul.mubr.msk.bf16.vlgmr.msra.gmra.mrb[12].mxu0 %vm1377_vm9, %v1337_v57 }
0x1196   :  { %v1415_v60 = vpop.f32.mrb[12].mxu0 }
0x1197   :  { %v1416_v61 = vadd.f32 %v2850_v58, %v1415_v60  ;;  %v3147_v0 = vpop.f32.mrb[13].mxu0 }
0x1198   :  { %v1418_v1 = vpop.f32.mrb[14].mxu0 }
0x1199   :  { %v1419_v3 = vadd.f32 %v2850_v58, %v1418_v1  ;;  %v3148_v5 = vpop.f32.mrb[15].mxu0  ;;  %v1422_v8 = vadd.f32 %v1416_v61, %v1249_v28 }
0x119b   :  { %v1426_v9 = vsel %vm188_vm4, %v1422_v8, 0.0  ;;  %v1423_v10 = vadd.f32 %v1419_v3, %v1250_v29 }
0x119c   :  { %1427 = vadd.xlane.f32.xlu1 %v1426_v9 }
0x119d   :  { %v1429_v53 = vsel %vm188_vm4, %v1423_v10, 0.0 }
0x119e   :  { %1430 = vadd.xlane.f32.xlu0 %v1429_v53 }
0x1229   :  { %v1428_v54 = vpop.xlane.xlu1 %1427 }
0x122a   :  { %v1432_v11 = vmul.f32 0.03125, %v1428_v54 }
0x122b   :  { %v1431_v12 = vpop.xlane.xlu0 %1430 }
0x122c   :  { %v1434_v13 = vsub.f32 %v1422_v8, %v1432_v11  ;;  %v1433_v14 = vmul.f32 0.03125, %v1431_v12 }
0x122e   :  { %v1435_v15 = vsub.f32 %v1423_v10, %v1433_v14  ;;  %v1436_v16 = vmul.f32 %v1434_v13, %v1434_v13 }
0x1230   :  { %v1438_v17 = vsel %vm188_vm4, %v1436_v16, 0.0  ;;  %v1437_v63 = vmul.f32 %v1435_v15, %v1435_v15 }
0x1231   :  { %1439 = vadd.xlane.f32.xlu1 %v1438_v17 }
0x1232   :  { %v1441_v18 = vsel %vm188_vm4, %v1437_v63, 0.0 }
0x1233   :  { %1442 = vadd.xlane.f32.xlu0 %v1441_v18 }
0x12be   :  { %v1440_v24 = vpop.xlane.xlu1 %1439 }
0x12bf   :  { %v1444_v25 = vmul.f32 0.03125, %v1440_v24 }
0x12c0   :  { %v1443_v26 = vpop.xlane.xlu0 %1442 }
0x12c1   :  { %v1446_v27 = vadd.f32 1e-05, %v1444_v25  ;;  %v1445_v28 = vmul.f32 0.03125, %v1443_v26 }
0x12c3   :  { %3534 = vrsqrt.f32 %v1446_v27  ;;  %v1447_v29 = vadd.f32 1e-05, %v1445_v28 }
0x12c5   :  { %3536 = vrsqrt.f32 %v1447_v29 }
0x12cd   :  { %v3535_v19 = vpop.eup %3534 }
0x12ce   :  { %v1450_v21 = vmul.f32 %v3535_v19, %v1434_v13 }
0x12cf   :  { %v3537_v30 = vpop.eup %3536 }
0x12d0   :  { %v1458_v31 = vmul.f32 %v2856_v20, %v1450_v21  ;;  %v1451_v32 = vmul.f32 %v3537_v30, %v1435_v15 }
0x12d2   :  { %v1459_v34 = vmul.f32 %v2856_v20, %v1451_v32  ;;  %v4018_v35 = vadd.f32 %v2857_v33, %v1458_v31 }
0x12d4   :  { %v4020_v36 = vadd.f32 %v2857_v33, %v1459_v34 }
0x12d6   :  { %v1468_v37 = vpack.c.bf16 %v4020_v36, %v4018_v35 }
0x12d8   :  { %3154 = vmatmul.mubr.msk.bf16.vlgmr.msra.gmra.mrb[24].mxu1 %vm188_vm4, %v1468_v37 }
0x13ab   :  { %v1523_v59 = vpop.f32.mrb[24].mxu1 }
0x13ac   :  { %v3155_v39 = vpop.f32.mrb[25].mxu1  ;;  %v4028_v62 = vadd.f32 %v2866_v38, %v1523_v59 }
0x13ad   :  { %v1526_v42 = vpop.f32.mrb[26].mxu1 }
0x13ae   :  { %v3156_v43 = vpop.f32.mrb[27].mxu1  ;;  %3161 = vmatprep.mubr.msk.f32.mxu1 %vm310_vm5, %v4028_v62  ;;  %v4032_v44 = vpack.i.bf16 %v1526_v42, %v1523_v59  ;;  %v4038_v45 = vadd.f32 %v2866_v38, %v1526_v42 }
0x13b0   :  { %3413 = vrot.lane.b32.xlu0 %v4032_v44, %s3613_s3  ;;  %3408 = vrot.lane.b32.xlu1 %v4032_v44, %s3612_s5 }
0x13b4   :  { %1740 = vrot.lane.b32.xlu1 %v4028_v62, %s3615_s4  ;;  %1742 = vrot.lane.b32.xlu0 %v4038_v45, %s3615_s4 }
0x13b8   :  { %3418 = vrot.lane.b32.xlu1 %v4032_v44, %s3618_s28  ;;  %1942 = vrot.lane.b32.xlu0 %v4038_v45, %s3617_s27 }
0x13bc   :  { %1940 = vrot.lane.b32.xlu1 %v4028_v62, %s3617_s27  ;;  %s4270_s27 = smov 40  }
0x1422   :  { %v3414_v46 = vpop.permute.xlu0 %3413  ;;  %v3409_v47 = vpop.permute.xlu1 %3408 }
0x1423   :  { %v3416_v40 = vunpack.i.h.bf16 %v3414_v46  ;;  %v3415_v41 = vunpack.i.l.bf16 %v3414_v46  ;;  %v3411_v48 = vunpack.i.h.bf16 %v3409_v47  ;;  %v3410_v49 = vunpack.i.l.bf16 %v3409_v47 }
0x1425   :  { %v3298_v50 = vpack.c.bf16 %v3416_v40, %v3415_v41  ;;  %v3288_v51 = vpack.c.bf16 %v3411_v48, %v3410_v49 }
0x1426   :  { %v1741_v52 = vpop.permute.xlu1 %1740  ;;  %v1743_v61 = vpop.permute.xlu0 %1742 }
0x1427   :  { %3290 = vmatprep.subr.msk.bf16.mxu1 %vm3816_vm6, %v3288_v51  ;;  %3300 = vmatprep.subr.msk.bf16.mxu0 %vm3816_vm6, %v3298_v50 }
0x1428   :  { %3175 = vmatprep.mubr.msk.f32.mxu0 %vm310_vm5, %v1741_v52  ;;  %3293 = vmatpush3.bf16.xpose.msk.msra.mxu1 %vm3816_vm6, %v3288_v51 }
0x1429   :  { %3303 = vmatpush3.bf16.xpose.msk.msra.mxu0 %vm3816_vm6, %v3298_v50 }
0x142a   :  { %v3419_v55 = vpop.permute.xlu1 %3418  ;;  %v1943_v0 = vpop.permute.xlu0 %1942 }
0x142b   :  { %v3421_v56 = vunpack.i.h.bf16 %v3419_v55  ;;  %v3420_v57 = vunpack.i.l.bf16 %v3419_v55 }
0x142d   :  { %v3308_v58 = vpack.c.bf16 %v3421_v56, %v3420_v57 }
0x142e   :  { %v1941_v60 = vpop.permute.xlu1 %1940 }
0x142f   :  { %3162 = vmatmul.mubr.msk.f32.vlgmr.msra.gmra.mrb[18].mxu1 %vm310_vm5, %v4038_v45  ;;  %3310 = vmatprep.subr.msk.bf16.mxu0 %vm3816_vm6, %v3308_v58 }
0x1430   :  { %3176 = vmatmul.mubr.msk.f32.vlgmr.msra.gmra.mrb[6].mxu0 %vm310_vm5, %v1743_v61 }
0x1431   :  { %3313 = vmatpush3.bf16.xpose.msk.msra.mxu0 %vm3816_vm6, %v3308_v58  ;;  %3189 = vmatprep.mubr.msk.f32.mxu0 %vm310_vm5, %v1941_v60 }
0x1438   :  { %3190 = vmatmul.mubr.msk.f32.vlgmr.msra.gmra.mrb[16].mxu0 %vm310_vm5, %v1943_v0 }
0x1502   :  { %v3163_v1 = vpop.f32.mrb[18].mxu1 }
0x1503   :  { %v1628_v3 = vadd.f32 %v3163_v1, %v3829_v6  ;;  %v3177_v5 = vpop.f32.mrb[6].mxu0  ;;  %v1622_v8 = vpop.f32.mrb[19].mxu1 }
0x1504   :  { %v1623_v9 = vadd.f32 %v1622_v8, %v3834_v7  ;;  %v1822_v10 = vpop.f32.mrb[7].mxu0  ;;  %v1828_v11 = vadd.f32 %v3177_v5, %v3829_v6 }
0x1505   :  { %v1823_v53 = vadd.f32 %v1822_v10, %v3834_v7  ;;  %v1634_v54 = vsel %vm396_vm7, %v1628_v3, -inf }
0x1506   :  { %1635 = vmax.xlane.f32.xlu0 %v1634_v54  ;;  %v1631_v12 = vsel %vm396_vm7, %v1623_v9, -inf  ;;  %v1834_v14 = vsel %vm396_vm7, %v1828_v11, -inf }
0x1507   :  { %1632 = vmax.xlane.f32.xlu1 %v1631_v12  ;;  %v1831_v13 = vsel %vm396_vm7, %v1823_v53, -inf }
0x150a   :  { %1832 = vmax.xlane.f32.xlu0 %v1831_v13 }
0x150b   :  { %v3191_v15 = vpop.f32.mrb[16].mxu0  ;;  %1835 = vmax.xlane.f32.xlu1 %v1834_v14 }
0x150c   :  { %v2028_v16 = vadd.f32 %v3191_v15, %v3829_v6  ;;  %v2022_v17 = vpop.f32.mrb[17].mxu0 }
0x150d   :  { %v2023_v63 = vadd.f32 %v2022_v17, %v3834_v7 }
0x150e   :  { %v2034_v18 = vsel %vm396_vm7, %v2028_v16, -inf }
0x150f   :  { %2035 = vmax.xlane.f32.xlu1 %v2034_v18  ;;  %v2031_v22 = vsel %vm396_vm7, %v2023_v63, -inf }
0x1510   :  { %2032 = vmax.xlane.f32.xlu0 %v2031_v22 }
0x1520   :  { %3428 = vrot.lane.b32.xlu1 %v4032_v44, %s3616_s22  ;;  %s4269_s22 = smov 16  }
0x1526   :  { %3423 = vrot.lane.b32.xlu0 %v4032_v44, %s3614_s26 }
0x1593   :  { %v1636_v23 = vpop.xlane.xlu0 %1635 }
0x1594   :  { %v1638_v24 = vsub.f32 %v1628_v3, %v1636_v23  ;;  %v1633_v25 = vpop.xlane.xlu1 %1632 }
0x1595   :  { %v1637_v26 = vsub.f32 %v1623_v9, %v1633_v25 }
0x1596   :  { %v1641_v6 = vmul.f32 1.442695, %v1638_v24 }
0x1597   :  { %v1639_v27 = vmul.f32 1.442695, %v1637_v26  ;;  %v1833_v28 = vpop.xlane.xlu0 %1832 }
0x1598   :  { %3538 = vpow2.f32 %v1641_v6  ;;  %v1837_v7 = vsub.f32 %v1823_v53, %v1833_v28  ;;  %v1836_v29 = vpop.xlane.xlu1 %1835 }
0x1599   :  { %3540 = vpow2.f32 %v1639_v27  ;;  %v1838_v19 = vsub.f32 %v1828_v11, %v1836_v29 }
0x159a   :  { %v1839_v20 = vmul.f32 1.442695, %v1837_v7 }
0x159b   :  { %v1841_v21 = vmul.f32 1.442695, %v1838_v19 }
0x159c   :  { %3542 = vpow2.f32 %v1839_v20  ;;  %v2036_v30 = vpop.xlane.xlu1 %2035 }
0x159d   :  { %3544 = vpow2.f32 %v1841_v21  ;;  %v2033_v31 = vpop.xlane.xlu0 %2032  ;;  %v2038_v57 = vsub.f32 %v2028_v16, %v2036_v30 }
0x159e   :  { %v2037_v32 = vsub.f32 %v2023_v63, %v2033_v31 }
0x159f   :  { %v2041_v58 = vmul.f32 1.442695, %v2038_v57 }
0x15a0   :  { %v2039_v33 = vmul.f32 1.442695, %v2037_v32  ;;  %v3429_v34 = vpop.permute.xlu1 %3428 }
0x15a1   :  { %v3431_v37 = vunpack.i.h.bf16 %v3429_v34  ;;  %v3424_v38 = vpop.permute.xlu0 %3423  ;;  %v3430_v39 = vunpack.i.l.bf16 %v3429_v34 }
0x15a2   :  { %v3539_v59 = vpop.eup %3538  ;;  %3546 = vpow2.f32 %v2039_v33  ;;  %v3426_v42 = vunpack.i.h.bf16 %v3424_v38  ;;  %v3425_v43 = vunpack.i.l.bf16 %v3424_v38  ;;  %v3582_v33 = vld [vmem:[%s4266_s23 + $0x8] sm:$0xff]  ;;  %v3583_v38 = vld [vmem:[%s4266_s23] sm:$0xff]  ;;  %s4268_s23 = smov 8  }
0x15a3   :  { %v3541_v46 = vpop.eup %3540  ;;  %v1646_v47 = vsel %vm396_vm7, %v3539_v59, 0.0  ;;  %v3304_v49 = vpack.c.bf16 %v3431_v37, %v3430_v39  ;;  %3548 = vpow2.f32 %v2041_v58 }
0x15a4   :  { %v3294_v40 = vpack.c.bf16 %v3426_v42, %v3425_v43  ;;  %1647 = vadd.xlane.f32.xlu1 %v1646_v47  ;;  %v1643_v41 = vsel %vm396_vm7, %v3541_v46, 0.0 }
0x15a5   :  { %1644 = vadd.xlane.f32.xlu0 %v1643_v41 }
0x15a6   :  { %v3543_v48 = vpop.eup %3542  ;;  %3295 = vmatprep.subr.bf16.mxu1 %v3294_v40 }
0x15a7   :  { %v3545_v50 = vpop.eup %3544  ;;  %3297 = vmatpush3.bf16.msra.mxu1 %v3294_v40  ;;  %v1843_v51 = vsel %vm396_vm7, %v3543_v48, 0.0 }
0x15a8   :  { %3305 = vmatprep.subr.bf16.mxu1 %v3304_v49  ;;  %v1846_v52 = vsel %vm396_vm7, %v3545_v50, 0.0 }
0x15a9   :  { %1847 = vadd.xlane.f32.xlu1 %v1846_v52  ;;  %1844 = vadd.xlane.f32.xlu0 %v1843_v51 }
0x15ac   :  { %v3547_v55 = vpop.eup %3546 }
0x15ad   :  { %v2043_v56 = vsel %vm396_vm7, %v3547_v55, 0.0  ;;  %v3549_v60 = vpop.eup %3548 }
0x15ae   :  { %2044 = vadd.xlane.f32.xlu0 %v2043_v56  ;;  %v2046_v61 = vsel %vm396_vm7, %v3549_v60, 0.0 }
0x15ba   :  { %3433 = vrot.lane.b32.xlu1 %v4032_v44, %s3619_s29 }
0x15c4   :  { %3438 = vrot.lane.b32.xlu0 %v4032_v44, %s3621_s30 }
0x15c8   :  { %2142 = vrot.lane.b32.xlu0 %v4038_v45, %s4267_s8 }
0x15de   :  { %2047 = vadd.xlane.f32.xlu1 %v2046_v61 }
0x15ef   :  { %2140 = vrot.lane.b32.xlu1 %v4028_v62, %s4267_s8 }
0x1631   :  { %v1648_v0 = vpop.xlane.xlu1 %1647 }
0x1632   :  { %3550 = vrcp.f32 %v1648_v0  ;;  %v1645_v1 = vpop.xlane.xlu0 %1644 }
0x1633   :  { %3552 = vrcp.f32 %v1645_v1 }
0x1636   :  { %v1848_v3 = vpop.xlane.xlu1 %1847  ;;  %v1845_v5 = vpop.xlane.xlu0 %1844 }
0x1637   :  { %3554 = vrcp.f32 %v1848_v3 }
0x1638   :  { %3556 = vrcp.f32 %v1845_v5 }
0x163a   :  { %v3434_v8 = vpop.permute.xlu1 %3433 }
0x163b   :  { %v2045_v9 = vpop.xlane.xlu0 %2044  ;;  %v3436_v53 = vunpack.i.h.bf16 %v3434_v8  ;;  %v3435_v54 = vunpack.i.l.bf16 %v3434_v8  ;;  %v3483_v8 = vld [vmem:[%s4238_s9 + $0x18] sm:$0xff]  }
0x163c   :  { %v3551_v45 = vpop.eup %3550  ;;  %3558 = vrcp.f32 %v2045_v9 }
0x163d   :  { %v3553_v10 = vpop.eup %3552  ;;  %v1652_v12 = vmul.f32 %v3551_v45, %v3539_v59  ;;  %v3314_v14 = vpack.c.bf16 %v3436_v53, %v3435_v54 }
0x163e   :  { %v1651_v11 = vmul.f32 %v3553_v10, %v3541_v46 }
0x163f   :  { %v3439_v13 = vpop.permute.xlu0 %3438 }
0x1640   :  { %3168 = vmatprep.mubr.msk.f32.mxu1 %vm396_vm7, %v1651_v11  ;;  %v3441_v17 = vunpack.i.h.bf16 %v3439_v13  ;;  %v3440_v63 = vunpack.i.l.bf16 %v3439_v13 }
0x1641   :  { %v3555_v62 = vpop.eup %3554  ;;  %3169 = vmatmul.mubr.msk.f32.vlgmr.msra.gmra.mrb[28].mxu1 %vm396_vm7, %v1652_v12 }
0x1642   :  { %v3557_v15 = vpop.eup %3556  ;;  %v1852_v16 = vmul.f32 %v3555_v62, %v3545_v50  ;;  %3307 = vmatpush3.bf16.msra.mxu1 %v3304_v49  ;;  %v3318_v23 = vpack.c.bf16 %v3441_v17, %v3440_v63 }
0x1643   :  { %3315 = vmatprep.subr.bf16.mxu1 %v3314_v14  ;;  %v1851_v18 = vmul.f32 %v3557_v15, %v3543_v48  ;;  %v2143_v28 = vpop.permute.xlu0 %2142 }
0x1645   :  { %3182 = vmatprep.mubr.msk.f32.mxu1 %vm396_vm7, %v1851_v18 }
0x1646   :  { %v3559_v22 = vpop.eup %3558  ;;  %3183 = vmatmul.mubr.msk.f32.vlgmr.msra.gmra.mrb[30].mxu1 %vm396_vm7, %v1852_v16 }
0x1647   :  { %3317 = vmatpush3.bf16.msra.mxu1 %v3314_v14  ;;  %v2051_v24 = vmul.f32 %v3559_v22, %v3547_v55 }
0x1648   :  { %3320 = vmatprep.subr.msk.bf16.mxu1 %vm3816_vm6, %v3318_v23 }
0x1649   :  { %3196 = vmatprep.mubr.msk.f32.mxu1 %vm396_vm7, %v2051_v24 }
0x166b   :  { %v2048_v25 = vpop.xlane.xlu1 %2047 }
0x166c   :  { %3560 = vrcp.f32 %v2048_v25 }
0x166f   :  { %v2141_v27 = vpop.permute.xlu1 %2140 }
0x1676   :  { %v3561_v26 = vpop.eup %3560 }
0x1677   :  { %v2052_v6 = vmul.f32 %v3561_v26, %v3549_v60  ;;  %v2896_v26 = vld [vmem:[%s4239_s10 + $0x1] ss:$0 sm:$0xff] }
0x1679   :  { %3197 = vmatmul.mubr.msk.f32.vlgmr.msra.gmra.mrb[32].mxu1 %vm396_vm7, %v2052_v6 }
0x167a   :  { %3323 = vmatpush3.bf16.xpose.msk.msra.mxu1 %vm3816_vm6, %v3318_v23  ;;  %3203 = vmatprep.mubr.msk.f32.mxu1 %vm310_vm5, %v2141_v27 }
0x167b   :  { %3221 = vmatprep.subr.bf16.mxu1 %v3609_v2 }
0x1681   :  { %3204 = vmatmul.mubr.msk.f32.vlgmr.msra.gmra.mrb[34].mxu1 %vm310_vm5, %v2143_v28 }
0x1682   :  { %3225 = vmatprep.mubr.msk.bf16.mxu1 %vm3610_vm0, %v3609_v2 }
0x1714   :  { %v4113_v7 = vpop.f32.mrb[28].mxu1 }
0x1715   :  { %v4115_v29 = vpop.f32.mrb[29].mxu1 }
0x1719   :  { %v3184_v19 = vpop.f32.mrb[30].mxu1 }
0x171a   :  { %v1931_v20 = vpop.f32.mrb[31].mxu1 }
0x171b   :  { %v3447_v21 = vpack.i.bf16 %v3184_v19, %v1931_v20 }
0x174c   :  { %v3198_v30 = vpop.f32.mrb[32].mxu1 }
0x174d   :  { %v2131_v4 = vpop.f32.mrb[33].mxu1 }
0x174e   :  { %v3452_v31 = vpack.i.bf16 %v3198_v30, %v2131_v4 }
0x1754   :  { %v3205_v32 = vpop.f32.mrb[34].mxu1 }
0x1755   :  { %v2228_v34 = vadd.f32 %v3582_v33, %v3205_v32  ;;  %v2222_v37 = vpop.f32.mrb[35].mxu1 }
0x1756   :  { %v2223_v59 = vadd.f32 %v3583_v38, %v2222_v37 }
0x1757   :  { %v2234_v39 = vsel %vm396_vm7, %v2228_v34, -inf }
0x1758   :  { %2235 = vmax.xlane.f32.xlu0 %v2234_v39  ;;  %v2231_v42 = vsel %vm396_vm7, %v2223_v59, -inf }
0x1759   :  { %2232 = vmax.xlane.f32.xlu1 %v2231_v42 }
0x17e5   :  { %v2236_v43 = vpop.xlane.xlu0 %2235 }
0x17e6   :  { %v2238_v46 = vsub.f32 %v2228_v34, %v2236_v43  ;;  %v2233_v47 = vpop.xlane.xlu1 %2232  ;;  %v3485_v43 = vld [vmem:[%s4242_s13 + $0x18] sm:$0xff]  }
0x17e7   :  { %v2237_v40 = vsub.f32 %v2223_v59, %v2233_v47 }
0x17e8   :  { %v2241_v41 = vmul.f32 1.442695, %v2238_v46 }
0x17e9   :  { %v2239_v48 = vmul.f32 1.442695, %v2237_v40 }
0x17ea   :  { %3562 = vpow2.f32 %v2241_v41 }
0x17eb   :  { %3564 = vpow2.f32 %v2239_v48 }
0x17f4   :  { %v3563_v49 = vpop.eup %3562 }
0x17f5   :  { %v3565_v50 = vpop.eup %3564  ;;  %v2246_v51 = vsel %vm396_vm7, %v3563_v49, 0.0 }
0x17f6   :  { %2247 = vadd.xlane.f32.xlu1 %v2246_v51  ;;  %v2243_v52 = vsel %vm396_vm7, %v3565_v50, 0.0  ;;  %v2902_v51 = vld [vmem:[%s4240_s11 + $0x1] ss:$0 sm:$0xff] }
0x17f7   :  { %2244 = vadd.xlane.f32.xlu0 %v2243_v52 }
0x1807   :  { %3448 = vrot.lane.b32.xlu1 %v3447_v21, %s4268_s23 }
0x180b   :  { %3453 = vrot.lane.b32.xlu1 %v3452_v31, %s4269_s22 }
0x180d   :  { %3443 = vrot.lane.b32.xlu0 %v4032_v44, %s4270_s27  ;;  %v3482_v44 = vld [vmem:[%s4238_s9 + $0x10] sm:$0xff]   ;;  %s4272_s9 = sld [smem:[#allocation7_spill]] }
0x1883   :  { %v2248_v55 = vpop.xlane.xlu1 %2247 }
0x1884   :  { %3566 = vrcp.f32 %v2248_v55  ;;  %v2245_v56 = vpop.xlane.xlu0 %2244 }
0x1885   :  { %3568 = vrcp.f32 %v2245_v56 }
0x1887   :  { %v3449_v53 = vpop.permute.xlu1 %3448 }
0x1888   :  { %v3444_v57 = vpop.permute.xlu0 %3443  ;;  %v3451_v11 = vunpack.i.h.bf16 %v3449_v53  ;;  %v3450_v12 = vunpack.i.l.bf16 %v3449_v53 }
0x1889   :  { %v3446_v58 = vunpack.i.h.bf16 %v3444_v57  ;;  %v3445_v60 = vunpack.i.l.bf16 %v3444_v57 }
0x188a   :  { %v2365_v15 = vsel %vm310_vm5, %v4113_v7, %v3451_v11  ;;  %v2364_v16 = vsel %vm310_vm5, %v4115_v29, %v3450_v12 }
0x188b   :  { %v3324_v61 = vpack.c.bf16 %v3446_v58, %v3445_v60  ;;  %v3454_v54 = vpop.permute.xlu1 %3453  ;;  %v2903_v58 = vld [vmem:[%s4241_s12 + $0x1] ss:$0 sm:$0xff] }
0x188c   :  { %v3456_v13 = vunpack.i.h.bf16 %v3454_v54  ;;  %v3455_v62 = vunpack.i.l.bf16 %v3454_v54 }
0x188d   :  { %3325 = vmatprep.subr.bf16.mxu0 %v3324_v61 }
0x188e   :  { %v3567_v0 = vpop.eup %3566  ;;  %3327 = vmatpush3.bf16.msra.mxu0 %v3324_v61  ;;  %v2366_v18 = vsel %vm396_vm7, %v2364_v16, %v3455_v62  ;;  %v2367_v22 = vsel %vm396_vm7, %v2365_v15, %v3456_v13 }
0x188f   :  { %v3569_v1 = vpop.eup %3568  ;;  %3213 = vmatprep.subr.bf16.mxu0 %v3609_v2  ;;  %v2252_v5 = vmul.f32 %v3567_v0, %v3563_v49 }
0x1890   :  { %v2251_v3 = vmul.f32 %v3569_v1, %v3565_v50 }
0x1892   :  { %3210 = vmatprep.mubr.msk.f32.mxu0 %vm396_vm7, %v2251_v3  ;;  %v3486_v3 = vld [vmem:[%s4244_s15 + $0x20] sm:$0xff]  }
0x1893   :  { %3211 = vmatmul.mubr.msk.f32.vlgmr.msra.gmra.mrb[18].mxu0 %vm396_vm7, %v2252_v5  ;;  %v3487_v5 = vld [vmem:[%s4244_s15 + $0x28] sm:$0xff]  }
0x1894   :  { %3217 = vmatprep.mubr.msk.bf16.mxu0 %vm3610_vm0, %v3609_v2  ;;  %3214 = vmatpush3.bf16.msra.mxu0 %v3482_v44  ;;  %v3488_v44 = vld [vmem:[%s4244_s15 + $0x30] sm:$0xff]  }
0x1895   :  { %3215 = vmatprep.subr.bf16.mxu0 %v3609_v2 }
0x1898   :  { %3216 = vmatpush3.bf16.msra.mxu0 %v3483_v8  ;;  %v3489_v8 = vld [vmem:[%s4244_s15 + $0x38] sm:$0xff]  }
0x1899   :  { %3229 = vmatprep.subr.bf16.mxu0 %v3609_v2 }
0x1966   :  { %v3212_v9 = vpop.f32.mrb[18].mxu0 }
0x1967   :  { %v2331_v45 = vpop.f32.mrb[19].mxu0 }
0x1968   :  { %v3457_v10 = vpack.i.bf16 %v3212_v9, %v2331_v45  ;;  %v2909_v9 = vld [vmem:[%s4243_s14 + $0x1] ss:$0 sm:$0xff] }
0x196a   :  { %3458 = vrot.lane.b32.xlu0 %v3457_v10, %s4271_s6 }
0x19dc   :  { %v3459_v14 = vpop.permute.xlu0 %3458 }
0x19dd   :  { %v3461_v17 = vunpack.i.h.bf16 %v3459_v14  ;;  %v3460_v63 = vunpack.i.l.bf16 %v3459_v14 }
0x19df   :  { %v2368_v23 = vsel %vm1134_vm8, %v2366_v18, %v3460_v63  ;;  %v2369_v24 = vsel %vm1134_vm8, %v2367_v22, %v3461_v17 }
0x19e0   :  { %v2370_v25 = vpack.c.bf16 %v2369_v24, %v2368_v23 }
0x19e2   :  { %3218 = vmatmul.mubr.msk.bf16.vlgmr.msra.gmra.mrb[20].mxu0 %vm188_vm4, %v2370_v25 }
0x19e3   :  { %3237 = vmatprep.mubr.msk.bf16.mxu0 %vm3610_vm0, %v3609_v2  ;;  %3230 = vmatpush3.bf16.msra.mxu0 %v3486_v3  ;;  %v2931_v3 = vld [vmem:[%s4247_s18 + $0x1] ss:$0 sm:$0xff] }
0x19e4   :  { %3231 = vmatprep.subr.bf16.mxu0 %v3609_v2 }
0x19e7   :  { %3232 = vmatpush3.bf16.msra.mxu0 %v3487_v5 }
0x19e8   :  { %3233 = vmatprep.subr.bf16.mxu0 %v3609_v2 }
0x19eb   :  { %3234 = vmatpush3.bf16.msra.mxu0 %v3488_v44 }
0x19ec   :  { %3235 = vmatprep.subr.bf16.mxu0 %v3609_v2 }
0x19ef   :  { %3236 = vmatpush3.bf16.msra.mxu0 %v3489_v8 }
0x1ab5   :  { %v2433_v6 = vpop.f32.mrb[20].mxu0 }
0x1ab6   :  { %v2434_v27 = vadd.f32 %v2896_v26, %v2433_v6  ;;  %v3219_v28 = vpop.f32.mrb[21].mxu0 }
0x1ab7   :  { %v2436_v7 = vpop.f32.mrb[22].mxu0 }
0x1ab8   :  { %v2437_v29 = vadd.f32 %v2896_v26, %v2436_v7  ;;  %v3220_v19 = vpop.f32.mrb[23].mxu0  ;;  %v2440_v20 = vadd.f32 %v2434_v27, %v4018_v35 }
0x1ab9   :  { %v2922_v19 = vld [vmem:[%s4245_s16 + $0x1] ss:$0 sm:$0xff] }
0x1aba   :  { %v2446_v21 = vsel %vm188_vm4, %v2440_v20, 0.0  ;;  %v2441_v30 = vadd.f32 %v2437_v29, %v4020_v36  ;;  %v3484_v36 = vld [vmem:[%s4242_s13 + $0x10] sm:$0xff]  }
0x1abb   :  { %2447 = vadd.xlane.f32.xlu1 %v2446_v21  ;;  %3222 = vmatpush3.bf16.msra.mxu1 %v3484_v36 }
0x1abc   :  { %v2449_v4 = vsel %vm188_vm4, %v2441_v30, 0.0  ;;  %3223 = vmatprep.subr.bf16.mxu1 %v3609_v2 }
0x1abd   :  { %2450 = vadd.xlane.f32.xlu0 %v2449_v4 }
0x1abf   :  { %3224 = vmatpush3.bf16.msra.mxu1 %v3485_v43 }
0x1b48   :  { %v2448_v31 = vpop.xlane.xlu1 %2447 }
0x1b49   :  { %v2452_v32 = vmul.f32 0.03125, %v2448_v31 }
0x1b4a   :  { %v2451_v33 = vpop.xlane.xlu0 %2450 }
0x1b4b   :  { %v2454_v34 = vsub.f32 %v2440_v20, %v2452_v32  ;;  %v2453_v37 = vmul.f32 0.03125, %v2451_v33 }
0x1b4d   :  { %v2455_v38 = vsub.f32 %v2441_v30, %v2453_v37  ;;  %v2456_v59 = vmul.f32 %v2454_v34, %v2454_v34 }
0x1b4f   :  { %v2458_v39 = vsel %vm188_vm4, %v2456_v59, 0.0  ;;  %v2457_v42 = vmul.f32 %v2455_v38, %v2455_v38 }
0x1b50   :  { %2459 = vadd.xlane.f32.xlu0 %v2458_v39 }
0x1b51   :  { %v2461_v35 = vsel %vm188_vm4, %v2457_v42, 0.0 }
0x1b52   :  { %2462 = vadd.xlane.f32.xlu1 %v2461_v35 }
0x1bdd   :  { %v2460_v46 = vpop.xlane.xlu0 %2459 }
0x1bde   :  { %v2464_v47 = vmul.f32 0.03125, %v2460_v46 }
0x1bdf   :  { %v2463_v40 = vpop.xlane.xlu1 %2462 }
0x1be0   :  { %v2466_v41 = vadd.f32 1e-05, %v2464_v47  ;;  %v2465_v48 = vmul.f32 0.03125, %v2463_v40 }
0x1be2   :  { %3570 = vrsqrt.f32 %v2466_v41  ;;  %v2467_v49 = vadd.f32 1e-05, %v2465_v48  ;;  %v3626_v48 = vmov 0.0|0.0  }
0x1be3   :  { %3328 = vmatprep.subr.bf16.mxu1 %v3626_v48 }
0x1be4   :  { %3572 = vrsqrt.f32 %v2467_v49 }
0x1bec   :  { %v3571_v50 = vpop.eup %3570 }
0x1bed   :  { %v2470_v52 = vmul.f32 %v3571_v50, %v2454_v34 }
0x1bee   :  { %v3573_v55 = vpop.eup %3572 }
0x1bef   :  { %v2478_v56 = vmul.f32 %v2902_v51, %v2470_v52  ;;  %v2471_v57 = vmul.f32 %v3573_v55, %v2455_v38 }
0x1bf1   :  { %v2479_v60 = vmul.f32 %v2902_v51, %v2471_v57  ;;  %v2486_v61 = vadd.f32 %v2903_v58, %v2478_v56 }
0x1bf3   :  { %v2487_v0 = vadd.f32 %v2903_v58, %v2479_v60  ;;  %v2930_v58 = vld [vmem:[%s4246_s17 + $0x1] ss:$0 sm:$0xff]  ;;  %s3627_s17 = smov [#allocation2]  }
0x1bf4   :  { %s2792_s2 = sshll.u32 %s3627_s17, 4  ;;  %s2793_s2 = int_to_ptr.vmem [resolvable:$true] %s2792_s2 }
0x1bf5   :  { %v2488_v1 = vpack.c.bf16 %v2487_v0, %v2486_v61  ;;  %s3584_s10 = scalar_lea.vmem %s2793_s2, 32  ;;  %p3589_p1 = scmp.lt.s32.totalorder %s2793_s2, %s2793_s2 }
0x1bf6   :  { %p3585_p0 = scmp.ne.s32.totalorder %s2793_s2, %s3584_s10  ;;  %p3590_p2 = scmp.lt.s32.totalorder %s3584_s10, %s3584_s10 }
0x1bf7   :  { %3226 = vmatmul.mubr.msk.bf16.vlgmr.msra.gmra.mrb[36].mxu1 %vm188_vm4, %v2488_v1 }
0x1bf8   :  { %3245 = vmatprep.mubr.msk.f32.mxu1 %vm3610_vm0, %v3609_v2  ;;  %p3591_p3 = por %p3590_p2, %p3589_p1 }
0x1bfa   :  { %p3592_p4 = pnand %p3591_p3, %p3585_p0 }
0x1cca   :  { %v2551_v45 = vpop.f32.mrb[36].mxu1 }
0x1ccb   :  { %v2552_v10 = vadd.f32 %v2909_v9, %v2551_v45  ;;  %v3227_v53 = vpop.f32.mrb[37].mxu1  ;;  %v2710_v45 = vld [vmem:[%s4272_s9] sm:$0x3] }
0x1ccc   :  { %v2554_v54 = vpop.f32.mrb[38].mxu1 }
0x1ccd   :  { %v2560_v11 = vmul.f32 0.044715, %v2552_v10  ;;  %v2555_v12 = vadd.f32 %v2909_v9, %v2554_v54  ;;  %v3228_v13 = vpop.f32.mrb[39].mxu1  ;;  %v2558_v26 = vmul.f32 0.5, %v2552_v10 }
0x1ccf   :  { %v2562_v62 = vmul.f32 %v2560_v11, %v2552_v10  ;;  %v2561_v14 = vmul.f32 0.044715, %v2555_v12  ;;  %v2559_v6 = vmul.f32 0.5, %v2555_v12 }
0x1cd1   :  { %v2564_v15 = vmul.f32 %v2562_v62, %v2552_v10  ;;  %v2563_v16 = vmul.f32 %v2561_v14, %v2555_v12 }
0x1cd3   :  { %v2566_v17 = vadd.f32 %v2564_v15, %v2552_v10  ;;  %v2565_v63 = vmul.f32 %v2563_v16, %v2555_v12 }
0x1cd5   :  { %v2568_v18 = vmul.f32 0.7978846, %v2566_v17  ;;  %v2567_v2 = vadd.f32 %v2565_v63, %v2555_v12 }
0x1cd7   :  { %3574 = vtanh.f32 %v2568_v18  ;;  %v2569_v22 = vmul.f32 0.7978846, %v2567_v2 }
0x1cd9   :  { %3576 = vtanh.f32 %v2569_v22 }
0x1ce1   :  { %v3575_v23 = vpop.eup %3574 }
0x1ce2   :  { %v2572_v24 = vadd.f32 1.0, %v3575_v23 }
0x1ce3   :  { %v3577_v25 = vpop.eup %3576 }
0x1ce4   :  { %v2573_v27 = vadd.f32 1.0, %v3577_v25  ;;  %v2574_v28 = vmul.f32 %v2572_v24, %v2558_v26 }
0x1ce6   :  { %v2575_v7 = vmul.f32 %v2573_v27, %v2559_v6 }
0x1ce8   :  { %v2576_v29 = vpack.c.bf16 %v2575_v7, %v2574_v28 }
0x1cea   :  { %3238 = vmatmul.mubr.msk.bf16.vlgmr.msra.gmra.mrb[24].mxu0 %vm1377_vm9, %v2576_v29 }
0x1dbd   :  { %v2655_v20 = vpop.f32.mrb[24].mxu0 }
0x1dbe   :  { %v2656_v21 = vadd.f32 %v2922_v19, %v2655_v20  ;;  %v3239_v30 = vpop.f32.mrb[25].mxu0 }
0x1dbf   :  { %v2658_v4 = vpop.f32.mrb[26].mxu0 }
0x1dc0   :  { %v2659_v31 = vadd.f32 %v2922_v19, %v2658_v4  ;;  %v3240_v32 = vpop.f32.mrb[27].mxu0  ;;  %v2662_v33 = vadd.f32 %v2656_v21, %v2486_v61 }
0x1dc2   :  { %v2668_v34 = vsel %vm188_vm4, %v2662_v33, 0.0  ;;  %v2663_v37 = vadd.f32 %v2659_v31, %v2487_v0 }
0x1dc3   :  { %2669 = vadd.xlane.f32.xlu0 %v2668_v34 }
0x1dc4   :  { %v2671_v38 = vsel %vm188_vm4, %v2663_v37, 0.0 }
0x1dc5   :  { %2672 = vadd.xlane.f32.xlu1 %v2671_v38 }
0x1e50   :  { %v2670_v59 = vpop.xlane.xlu0 %2669 }
0x1e51   :  { %v2674_v39 = vmul.f32 0.03125, %v2670_v59 }
0x1e52   :  { %v2673_v42 = vpop.xlane.xlu1 %2672 }
0x1e53   :  { %v2676_v35 = vsub.f32 %v2662_v33, %v2674_v39  ;;  %v2675_v36 = vmul.f32 0.03125, %v2673_v42 }
0x1e55   :  { %v2677_v43 = vsub.f32 %v2663_v37, %v2675_v36  ;;  %v2678_v46 = vmul.f32 %v2676_v35, %v2676_v35 }
0x1e57   :  { %v2680_v47 = vsel %vm188_vm4, %v2678_v46, 0.0  ;;  %v2679_v40 = vmul.f32 %v2677_v43, %v2677_v43 }
0x1e58   :  { %2681 = vadd.xlane.f32.xlu0 %v2680_v47 }
0x1e59   :  { %v2683_v41 = vsel %vm188_vm4, %v2679_v40, 0.0 }
0x1e5a   :  { %2684 = vadd.xlane.f32.xlu1 %v2683_v41 }
0x1ee5   :  { %v2682_v49 = vpop.xlane.xlu0 %2681 }
0x1ee6   :  { %v2686_v50 = vmul.f32 0.03125, %v2682_v49 }
0x1ee7   :  { %v2685_v51 = vpop.xlane.xlu1 %2684 }
0x1ee8   :  { %v2688_v52 = vadd.f32 1e-05, %v2686_v50  ;;  %v2687_v55 = vmul.f32 0.03125, %v2685_v51 }
0x1eea   :  { %3578 = vrsqrt.f32 %v2688_v52  ;;  %v2689_v56 = vadd.f32 1e-05, %v2687_v55 }
0x1eec   :  { %3580 = vrsqrt.f32 %v2689_v56 }
0x1ef4   :  { %v3579_v57 = vpop.eup %3578 }
0x1ef5   :  { %v2692_v60 = vmul.f32 %v3579_v57, %v2676_v35 }
0x1ef6   :  { %v3581_v61 = vpop.eup %3580 }
0x1ef7   :  { %v2693_v0 = vmul.f32 %v3581_v61, %v2677_v43  ;;  %v2700_v1 = vmul.f32 %v2930_v58, %v2692_v60 }
0x1ef9   :  { %v2701_v5 = vmul.f32 %v2930_v58, %v2693_v0  ;;  %v2708_v44 = vadd.f32 %v2931_v3, %v2700_v1 }
0x1efb   :  { %v2709_v8 = vadd.f32 %v2931_v3, %v2701_v5 }
0x1efd   :  { %v3329_v9 = vpack.c.bf16 %v2709_v8, %v2708_v44 }
0x1eff   :  { %3330 = vmatpush3.bf16.msra.mxu1 %v3329_v9 }
0x1f02   :  { %3246 = vmatmul.mubr.msk.f32.vlgmr.msra.gmra.mrb[40].mxu1 %vm396_vm7, %v2710_v45 }
0x1fd5   :  { %v2780_v10 = vpop.f32.mrb[40].mxu1 }
0x1fd6   :  { %2785 = vst.msk [vmem:[#allocation2] sm:$0x3] %vm2784_vm10, %v2780_v10  ;;  %v3247_v53 = vpop.f32.mrb[41].mxu1 }
0x1fd7   :  { %3595 = shalt.err (!%p3592_p4)
}
0x1fd8   :  { %s3596_s21 = scalar_lea.hbm %s4248_s19, 32 }
0x1fd9   :  { %p3597_p5 = scmp.ne.s32.totalorder %s4248_s19, %s3596_s21  ;;  %p3600_p6 = scmp.lt.u32.totalorder %s3596_s21, %s4248_s19 }
0x1fdb   :  { %p3602_p7 = pnand %p3600_p6, %p3597_p5 }
0x1fdd   :  { %3605 = shalt.err (!%p3602_p7)
}
0x1fde   :  { %2795 = dma.vmem_to_hbm [thread:$0]  %s2793_s2, 32, %s4248_s19, [#allocation3]  }
0x1fdf   :  { %3606 = dma.done.wait [#allocation3], 32  }
0x1fe0   :  { %3607 = vsyncadd [#allocation3], 4294967264 }
0x1fe1   :  { %2799 = vsyncpa [#allocation3], 1 }

</bundles_post_ra>
